<compile_context>
chip_gen: v7x
topology: tpu7x:2x2x1
jax: 0.10.0
libtpu: 0.0.40
codegen_flags: <defaults>
</compile_context>

<pallas_src>
import jax
import jax.numpy as jnp
from jax.experimental import pallas as pl
from jax.experimental.pallas import tpu as pltpu


def tcn_kernel(x_ref, w_ref, scale_ref, shift_ref, o_ref, lhs_ref):
    # x_ref    : (1, T, vt, C)   channels-last activation tile (bf16)
    # w_ref    : (3*C, O)        conv taps folded into the contraction dim (bf16)
    # scale_ref: (1, O)          gamma * rsqrt(var + eps)          (f32)
    # shift_ref: (1, O)          beta - mean * scale               (f32)
    # o_ref    : (1, T, vt, O)   output tile
    # lhs_ref  : (T, vt, 3*C)    bf16 im2col scratch (single staging buffer)
    x = x_ref[0]                                     # (T, vt, C) bf16
    T, vt, C = x.shape
    O = o_ref.shape[3]

    # im2col straight into the scratch: three shifted copies of x along the lane dim.
    # In-kernel time halo: zero rows at t=0 (prev tap) and t=T-1 (next tap).
    zrow = jnp.zeros((1, vt, C), dtype=x.dtype)
    lhs_ref[pl.ds(0, 1), :, pl.ds(0, C)] = zrow                  # x[t-1], t = 0
    lhs_ref[pl.ds(1, T - 1), :, pl.ds(0, C)] = x[: T - 1]        # x[t-1], t >= 1
    lhs_ref[:, :, pl.ds(C, C)] = x                               # x[t]
    lhs_ref[pl.ds(0, T - 1), :, pl.ds(2 * C, C)] = x[1:]         # x[t+1], t <= T-2
    lhs_ref[pl.ds(T - 1, 1), :, pl.ds(2 * C, C)] = zrow          # x[t+1], t = T-1

    # Single MXU matmul with K = 3C (bf16 operands, f32 accumulation).
    lhs = lhs_ref[...].reshape(T * vt, 3 * C)
    acc = jnp.dot(lhs, w_ref[...], preferred_element_type=jnp.float32)  # (T*vt, O) f32

    # Mish with a single exp:  mish(a) = a * (u^2 + 2u) / (u^2 + 2u + 2),  u = e^min(a, 20).
    # (For a > 20 the ratio is 1.0 in f32, matching PyTorch's softplus threshold.)
    u = jnp.exp(jnp.minimum(acc, 20.0))
    num = u * (u + 2.0)
    y = acc * (num * pl.reciprocal(num + 2.0, approx=True))

    # BatchNorm (inference), pre-folded to one scale/shift per output channel.
    y = y * scale_ref[0] + shift_ref[0]

    o_ref[...] = y.reshape(1, T, vt, O).astype(o_ref.dtype)


def _vmem_bytes(t, bv, c, o, out_itemsize):
    """Rough per-grid-step VMEM footprint (double-buffered blocks + scratch + epilogue)."""
    m = t * bv
    x_blk = m * c * 2                 # bf16 input block
    o_blk = m * o * out_itemsize      # output block
    lhs = m * 3 * c * 2               # bf16 im2col scratch
    w = 3 * c * o * 2                 # bf16 weights
    epi = 3 * m * o * 4               # f32 acc + Mish temporaries
    return 2 * x_blk + 2 * o_blk + 2 * w + lhs + epi


def _pick_block_v(v_pad, t, c, o, out_itemsize, n, budget=24 << 20):
    cands = [bv for bv in range(8, v_pad + 1, 8) if v_pad % bv == 0]
    if not cands:
        cands = [v_pad]
    fits = [bv for bv in cands if _vmem_bytes(t, bv, c, o, out_itemsize) <= budget]
    if not fits:
        fits = [min(cands)]
    if n == 1:
        # Keep >= 2 v-tiles so both v7x TensorCores get work when the batch axis is 1.
        multi = [bv for bv in fits if v_pad // bv >= 2]
        if multi:
            fits = multi
    # Prefer MXU M-alignment: multiples of 256 (v6e/v7x), then 128 (v5e), else biggest tile.
    for mod in (256, 128):
        aligned = [bv for bv in fits if (t * bv) % mod == 0]
        if aligned:
            return max(aligned)
    return max(fits)


def tcn_forward_ntvc(x_ntvc, conv_w, gamma, beta, running_mean, running_var,
                     *, block_v=None, out_dtype=jnp.float32, buffer_depth=None):
    """Channels-last entry point.  x_ntvc: [n, t, v, in_c].  Returns [n, t, v, out_c]
    in `out_dtype` — no layout transposes, so layers chained in NTVC skip them entirely."""
    n, t, v, c = x_ntvc.shape
    out_c = conv_w.shape[0]
    out_itemsize = jnp.dtype(out_dtype).itemsize

    # bf16 activation feed: halves the HBM read and the im2col staging bytes.
    x_ntvc = x_ntvc.astype(jnp.bfloat16)

    # Pad v to a multiple of 8 (sublane-dense tiles, unmasked writeback); slice afterwards.
    v_pad = ((v + 7) // 8) * 8
    if v_pad != v:
        x_ntvc = jnp.pad(x_ntvc, ((0, 0), (0, 0), (0, v_pad - v), (0, 0)))

    if block_v is None or v_pad % block_v != 0 or block_v % 8 != 0:
        block_v = _pick_block_v(v_pad, t, c, out_c, out_itemsize, n)
    v_tiles = v_pad // block_v

    # Conv weight (out_c, in_c, 3, 1) -> (3*in_c, out_c), tap-major, bf16 for the MXU.
    w3c = jnp.transpose(conv_w[:, :, :, 0], (2, 1, 0)).reshape(3 * c, out_c)
    w3c = w3c.astype(jnp.bfloat16)

    # Fold BN (inference) into one per-channel scale/shift.
    eps = 1e-5
    inv_std = jax.lax.rsqrt(running_var.astype(jnp.float32) + eps)
    scale = (gamma.astype(jnp.float32) * inv_std).reshape(1, out_c)
    shift = (beta.astype(jnp.float32)
             - running_mean.astype(jnp.float32) * gamma.astype(jnp.float32) * inv_std
             ).reshape(1, out_c)

    # Optional deeper pipelining on the activation input for large grids.
    x_spec_kwargs = {}
    if buffer_depth is not None and v_tiles >= buffer_depth:
        x_spec_kwargs["pipeline_mode"] = pl.Buffered(buffer_depth)

    out = pl.pallas_call(
        tcn_kernel,
        out_shape=jax.ShapeDtypeStruct((n, t, v_pad, out_c), out_dtype),
        grid_spec=pltpu.PrefetchScalarGridSpec(
            num_scalar_prefetch=0,
            grid=(n, v_tiles),
            in_specs=[
                pl.BlockSpec((1, t, block_v, c), lambda i, j: (i, 0, j, 0),
                             **x_spec_kwargs),
                pl.BlockSpec((3 * c, out_c), lambda i, j: (0, 0)),
                pl.BlockSpec((1, out_c), lambda i, j: (0, 0)),
                pl.BlockSpec((1, out_c), lambda i, j: (0, 0)),
            ],
            out_specs=pl.BlockSpec((1, t, block_v, out_c), lambda i, j: (i, 0, j, 0)),
            scratch_shapes=[pltpu.VMEM((t, block_v, 3 * c), jnp.bfloat16)],
        ),
        compiler_params=pltpu.CompilerParams(
            dimension_semantics=("parallel", "parallel"),
            vmem_limit_bytes=48 * 1024 * 1024),   # safe on v5e/v6e (128 MiB) and v7x (64 MiB)
    )(x_ntvc, w3c, scale, shift)

    if v_pad != v:
        out = out[:, :, :v, :]
    return out


def tcn_forward(x, conv_w, gamma, beta, running_mean, running_var,
                *, block_v=None, out_dtype=jnp.float32, buffer_depth=None):
    """PyTorch-shaped wrapper.  x: [n, in_c, t, v] (NCHW).  Returns [n, out_c, t, v].
    The two transposes here are layout plumbing only; chain tcn_forward_ntvc to skip them."""
    out_ntvc = tcn_forward_ntvc(jnp.transpose(x, (0, 2, 3, 1)),
                                conv_w, gamma, beta, running_mean, running_var,
                                block_v=block_v, out_dtype=out_dtype,
                                buffer_depth=buffer_depth)
    return jnp.transpose(out_ntvc, (0, 3, 1, 2))


def tcn_reference(x, conv_w, gamma, beta, running_mean, running_var):
    """Pure-JAX reference (bf16 conv operands + f32 accum, Mish, BN inference)."""
    y = jax.lax.conv_general_dilated(
        x.astype(jnp.bfloat16), conv_w.astype(jnp.bfloat16),
        window_strides=(1, 1), padding=((1, 1), (0, 0)),
        dimension_numbers=("NCHW", "OIHW", "NCHW"),
        preferred_element_type=jnp.float32)
    sp = jnp.where(y > 20.0, y, jnp.log1p(jnp.exp(jnp.minimum(y, 20.0))))
    y = y * jnp.tanh(sp)
    eps = 1e-5
    inv = jax.lax.rsqrt(running_var.astype(jnp.float32) + eps)
    scale = (gamma * inv).reshape(1, -1, 1, 1)
    shift = (beta - running_mean * gamma * inv).reshape(1, -1, 1, 1)
    return y * scale + shift


if __name__ == "__main__":
    def make_inputs(key, n, in_c, out_c, t, v):
        kx, kw, kg, kb, km, kv = jax.random.split(key, 6)
        x = jax.random.normal(kx, (n, in_c, t, v), dtype=jnp.float32)
        conv_w = 0.05 * jax.random.normal(kw, (out_c, in_c, 3, 1), dtype=jnp.float32)
        gamma = 1.0 + 0.1 * jax.random.normal(kg, (out_c,), dtype=jnp.float32)
        beta = 0.1 * jax.random.normal(kb, (out_c,), dtype=jnp.float32)
        rm = 0.1 * jax.random.normal(km, (out_c,), dtype=jnp.float32)
        rv = 0.5 + jax.random.uniform(kv, (out_c,), dtype=jnp.float32)
        return x, conv_w, gamma, beta, rm, rv

    # Case 1: lane-dense shapes, v multiple of 8 -> block_v = v (M = T*v = 256, grid (2, 1)).
    n, in_c, out_c, t, v = 2, 128, 128, 16, 16
    args = make_inputs(jax.random.PRNGKey(0), n, in_c, out_c, t, v)
    out = jax.block_until_ready(tcn_forward(*args))
    ref = tcn_reference(*args)
    assert out.shape == (n, out_c, t, v), out.shape
    err = float(jnp.max(jnp.abs(out - ref)))
    assert jnp.allclose(out, ref, rtol=1e-2, atol=1e-2), err

    # Case 2: n=1, v=25 (typical joint count) -> v padded to 32, 2 v-tiles so both
    # v7x TensorCores get work; padded columns sliced off after the kernel.
    n2, t2, v2 = 1, 8, 25
    args2 = make_inputs(jax.random.PRNGKey(1), n2, in_c, out_c, t2, v2)
    out2 = jax.block_until_ready(tcn_forward(*args2))
    ref2 = tcn_reference(*args2)
    assert out2.shape == (n2, out_c, t2, v2), out2.shape
    err2 = float(jnp.max(jnp.abs(out2 - ref2)))
    assert jnp.allclose(out2, ref2, rtol=1e-2, atol=1e-2), err2

    print("KERNEL_OK")
</pallas_src>

<mosaic_0001>
module attributes {stable_mosaic.version = 11 : i64} {
  func.func @tcn_kernel(%arg0: i32, %arg1: i32, %arg2: memref<1x16x16x128xbf16, #tpu.memory_space<vmem>>, %arg3: memref<384x128xbf16, #tpu.memory_space<vmem>>, %arg4: memref<1x128xf32, #tpu.memory_space<vmem>>, %arg5: memref<1x128xf32, #tpu.memory_space<vmem>>, %arg6: memref<1x16x16x128xf32, #tpu.memory_space<vmem>>, %arg7: memref<16x16x384xbf16, #tpu.memory_space<vmem>>) attributes {dimension_semantics = [#tpu.dimension_semantics<parallel>, #tpu.dimension_semantics<parallel>], iteration_bounds = array<i64: 2, 1>, scalar_prefetch = 0 : i64, scratch_operands = 1 : i64, tpu.core_type = #tpu.core_type<tc>, window_params = [{transform_indices = @transform_0, window_bounds = array<i64: 1, 16, 16, 128>}, {pipeline_mode = #tpu.pipeline_mode<synchronous>, transform_indices = @transform_1, window_bounds = array<i64: 384, 128>}, {pipeline_mode = #tpu.pipeline_mode<synchronous>, transform_indices = @transform_2, window_bounds = array<i64: 1, 128>}, {pipeline_mode = #tpu.pipeline_mode<synchronous>, transform_indices = @transform_3, window_bounds = array<i64: 1, 128>}, {transform_indices = @transform_4, window_bounds = array<i64: 1, 16, 16, 128>}]} {
    %c0 = arith.constant 0 : index
    %c0_0 = arith.constant 0 : index
    %c0_1 = arith.constant 0 : index
    %c0_2 = arith.constant 0 : index
    %0 = vector.load %arg2[%c0, %c0_0, %c0_1, %c0_2] : memref<1x16x16x128xbf16, #tpu.memory_space<vmem>>, vector<1x16x16x128xbf16>
    %1 = vector.shape_cast %0 : vector<1x16x16x128xbf16> to vector<16x16x128xbf16>
    %cst = arith.constant 0.000000e+00 : bf16
    %2 = vector.broadcast %cst : bf16 to vector<1x16x128xbf16>
    %c0_3 = arith.constant 0 : index
    %c0_4 = arith.constant 0 : index
    %c0_5 = arith.constant 0 : index
    %3 = vector.load %arg7[%c0_3, %c0_4, %c0_5] : memref<16x16x384xbf16, #tpu.memory_space<vmem>>, vector<1x16x128xbf16>
    tpu.vector_store %arg7[%c0_3, %c0_4, %c0_5], %2 {strides = array<i32>} : memref<16x16x384xbf16, #tpu.memory_space<vmem>>, vector<1x16x128xbf16>,
    %4 = vector.extract_strided_slice %1 {offsets = [0, 0, 0], sizes = [15, 16, 128], strides = [1, 1, 1]} : vector<16x16x128xbf16> to vector<15x16x128xbf16>
    %c1 = arith.constant 1 : index
    %c0_6 = arith.constant 0 : index
    %c0_7 = arith.constant 0 : index
    %5 = vector.load %arg7[%c1, %c0_6, %c0_7] : memref<16x16x384xbf16, #tpu.memory_space<vmem>>, vector<15x16x128xbf16>
    tpu.vector_store %arg7[%c1, %c0_6, %c0_7], %4 {strides = array<i32>} : memref<16x16x384xbf16, #tpu.memory_space<vmem>>, vector<15x16x128xbf16>,
    %c0_8 = arith.constant 0 : index
    %c0_9 = arith.constant 0 : index
    %c128 = arith.constant 128 : index
    %6 = vector.load %arg7[%c0_8, %c0_9, %c128] : memref<16x16x384xbf16, #tpu.memory_space<vmem>>, vector<16x16x128xbf16>
    tpu.vector_store %arg7[%c0_8, %c0_9, %c128], %1 {strides = array<i32>} : memref<16x16x384xbf16, #tpu.memory_space<vmem>>, vector<16x16x128xbf16>,
    %7 = vector.extract_strided_slice %1 {offsets = [1, 0, 0], sizes = [15, 16, 128], strides = [1, 1, 1]} : vector<16x16x128xbf16> to vector<15x16x128xbf16>
    %c0_10 = arith.constant 0 : index
    %c0_11 = arith.constant 0 : index
    %c256 = arith.constant 256 : index
    %8 = vector.load %arg7[%c0_10, %c0_11, %c256] : memref<16x16x384xbf16, #tpu.memory_space<vmem>>, vector<15x16x128xbf16>
    tpu.vector_store %arg7[%c0_10, %c0_11, %c256], %7 {strides = array<i32>} : memref<16x16x384xbf16, #tpu.memory_space<vmem>>, vector<15x16x128xbf16>,
    %c15 = arith.constant 15 : index
    %c0_12 = arith.constant 0 : index
    %c256_13 = arith.constant 256 : index
    %9 = vector.load %arg7[%c15, %c0_12, %c256_13] : memref<16x16x384xbf16, #tpu.memory_space<vmem>>, vector<1x16x128xbf16>
    tpu.vector_store %arg7[%c15, %c0_12, %c256_13], %2 {strides = array<i32>} : memref<16x16x384xbf16, #tpu.memory_space<vmem>>, vector<1x16x128xbf16>,
    %c0_14 = arith.constant 0 : index
    %c0_15 = arith.constant 0 : index
    %c0_16 = arith.constant 0 : index
    %10 = vector.load %arg7[%c0_14, %c0_15, %c0_16] : memref<16x16x384xbf16, #tpu.memory_space<vmem>>, vector<16x16x384xbf16>
    %11 = vector.shape_cast %10 : vector<16x16x384xbf16> to vector<256x384xbf16>
    %c0_17 = arith.constant 0 : index
    %c0_18 = arith.constant 0 : index
    %12 = vector.load %arg3[%c0_17, %c0_18] : memref<384x128xbf16, #tpu.memory_space<vmem>>, vector<384x128xbf16>
    %cst_19 = arith.constant dense<0.000000e+00> : vector<256x128xf32>
    %13 = tpu.matmul %11, %12, %cst_19 {dimension_numbers = #tpu.dot_dimension_numbers<[1], [0], [0], [1], [0, 0, 1, 1], [], []>} : vector<256x384xbf16>, vector<384x128xbf16>, vector<256x128xf32> -> vector<256x128xf32>
    %cst_20 = arith.constant 2.000000e+01 : f32
    %14 = vector.broadcast %cst_20 : f32 to vector<256x128xf32>
    %15 = arith.minimumf %13, %14 : vector<256x128xf32>
    %16 = math.exp %15 : vector<256x128xf32>
    %cst_21 = arith.constant 2.000000e+00 : f32
    %17 = vector.broadcast %cst_21 : f32 to vector<256x128xf32>
    %18 = arith.addf %16, %17 : vector<256x128xf32>
    %19 = arith.mulf %16, %18 : vector<256x128xf32>
    %cst_22 = arith.constant 2.000000e+00 : f32
    %20 = vector.broadcast %cst_22 : f32 to vector<256x128xf32>
    %21 = arith.addf %19, %20 : vector<256x128xf32>
    %22 = tpu.reciprocal %21 {approx = true} : vector<256x128xf32> -> vector<256x128xf32>
    %23 = arith.mulf %19, %22 : vector<256x128xf32>
    %24 = arith.mulf %13, %23 : vector<256x128xf32>
    %c0_23 = arith.constant 0 : index
    %c0_24 = arith.constant 0 : index
    %25 = vector.load %arg4[%c0_23, %c0_24] : memref<1x128xf32, #tpu.memory_space<vmem>>, vector<1x128xf32>
    %26 = vector.shape_cast %25 : vector<1x128xf32> to vector<128xf32>
    %27 = vector.shape_cast %26 : vector<128xf32> to vector<1x128xf32>
    %28 = vector.broadcast %27 : vector<1x128xf32> to vector<256x128xf32>
    %29 = arith.mulf %24, %28 : vector<256x128xf32>
    %c0_25 = arith.constant 0 : index
    %c0_26 = arith.constant 0 : index
    %30 = vector.load %arg5[%c0_25, %c0_26] : memref<1x128xf32, #tpu.memory_space<vmem>>, vector<1x128xf32>
    %31 = vector.shape_cast %30 : vector<1x128xf32> to vector<128xf32>
    %32 = vector.shape_cast %31 : vector<128xf32> to vector<1x128xf32>
    %33 = vector.broadcast %32 : vector<1x128xf32> to vector<256x128xf32>
    %34 = arith.addf %29, %33 : vector<256x128xf32>
    %35 = vector.shape_cast %34 : vector<256x128xf32> to vector<1x16x16x128xf32>
    %c0_27 = arith.constant 0 : index
    %c0_28 = arith.constant 0 : index
    %c0_29 = arith.constant 0 : index
    %c0_30 = arith.constant 0 : index
    %36 = vector.load %arg6[%c0_27, %c0_28, %c0_29, %c0_30] : memref<1x16x16x128xf32, #tpu.memory_space<vmem>>, vector<1x16x16x128xf32>
    tpu.vector_store %arg6[%c0_27, %c0_28, %c0_29, %c0_30], %35 {strides = array<i32>} : memref<1x16x16x128xf32, #tpu.memory_space<vmem>>, vector<1x16x16x128xf32>,
    return
  }
  func.func @transform_0(%arg0: i32, %arg1: i32) -> (i32, i32, i32, i32) {
    %c0_i32 = arith.constant 0 : i32
    %c0_i32_0 = arith.constant 0 : i32
    %c0_i32_1 = arith.constant 0 : i32
    return %arg0, %c0_i32, %arg1, %c0_i32_0 : i32, i32, i32, i32
  }
  func.func @transform_1(%arg0: i32, %arg1: i32) -> (i32, i32) {
    %c0_i32 = arith.constant 0 : i32
    %c0_i32_0 = arith.constant 0 : i32
    %c0_i32_1 = arith.constant 0 : i32
    return %c0_i32, %c0_i32_0 : i32, i32
  }
  func.func @transform_2(%arg0: i32, %arg1: i32) -> (i32, i32) {
    %c0_i32 = arith.constant 0 : i32
    %c0_i32_0 = arith.constant 0 : i32
    %c0_i32_1 = arith.constant 0 : i32
    return %c0_i32, %c0_i32_0 : i32, i32
  }
  func.func @transform_3(%arg0: i32, %arg1: i32) -> (i32, i32) {
    %c0_i32 = arith.constant 0 : i32
    %c0_i32_0 = arith.constant 0 : i32
    %c0_i32_1 = arith.constant 0 : i32
    return %c0_i32, %c0_i32_0 : i32, i32
  }
  func.func @transform_4(%arg0: i32, %arg1: i32) -> (i32, i32, i32, i32) {
    %c0_i32 = arith.constant 0 : i32
    %c0_i32_0 = arith.constant 0 : i32
    %c0_i32_1 = arith.constant 0 : i32
    return %arg0, %c0_i32, %arg1, %c0_i32_0 : i32, i32, i32, i32
  }
}

</mosaic_0001>

<bundles_post_ra>
// kernel: tpu_custom_call.1
= control target key start
LH: loop header
LB: loop body
LE: loop exit
PB: predicated region body
PF: predicated region fallthrough
CT: control target
= control target key end

     0   :  { %9 = vsyncpa [#allocation4], 0  ;;  %s2904_s0 = inlined_call_operand.hbm [shape: bf16[2,16,16,128], index: 0, kind: input, shape index: {}]   ;;  %s2905_s1 = inlined_call_operand.hbm [shape: bf16[384,128], index: 1, kind: input, shape index: {}]   ;;  %s2906_s2 = inlined_call_operand.vmem [shape: f32[1,128], index: 2, kind: input, shape index: {}]   ;;  %s2907_s3 = inlined_call_operand.vmem [shape: f32[1,128], index: 3, kind: input, shape index: {}]   ;;  %s2908_s4 = inlined_call_operand.hbm [shape: f32[2,16,16,128], index: 4, kind: output, shape index: {}]  }
   0x1   :  { %11 = vsyncpa [#allocation4 + $0x1], 0 }
   0x2   :  { %12 = vsyncpa [#allocation7], 0 }
   0x3   :  { %13 = vsyncpa [#allocation5], 0 }
   0x4   :  { %15 = vsyncpa [#allocation5 + $0x1], 0  ;;  %s2189_s15 = smov 0   ;;  %s2191_s16 = smov 0  }
   0x5   :  { %s2193_s17 = smov 0   ;;  %s2195_s18 = smov 0  }
   0x6   :  { %s2197_s19 = smov 0   ;;  %s2199_s20 = smov 0  }
   0x7 LB: > { %s1503_s21 = sadd.s32 4294967295, %s2154_s20   ;;  %s1504_s22 = sadd.s32 4294967294, %s2154_s20   ;;  %s2154_s20 = sphi %s2199_s20, %s21_s20   ;;  %s2150_s19 = sphi %s2197_s19, %s2932_s19   ;;  %s2146_s18 = sphi %s2195_s18, %s2931_s18   ;;  %s2142_s17 = sphi %s2193_s17, %s2930_s17   ;;  %s2138_s16 = sphi %s2191_s16, %s2929_s16   ;;  %s2134_s15 = sphi %s2189_s15, %s2928_s15  }
   0x8   : > { %p55_p0 = scmp.ne.s32.totalorder %s2138_s16, %s2134_s15  ;;  %p2223_p1 = scmp.eq.s32.totalorder %s1503_s21, 0 }
   0x9   : > { %p2227_p2 = scmp.eq.s32.totalorder %s1503_s21, 1  ;;  %p150_p3 = scmp.eq.s32.totalorder %s1504_s22, 1 }
   0xa   : > { %s2913_s23 = scalar_select %p2223_p1, 1, 0 }
   0xb   : > { %s2914_s24 = scalar_select %p2227_p2, 1, 0 }
   0xc   : > { %p2233_p4 = por %p2223_p1, %p55_p0  ;;  %p1505_p5 = scmp.ge.s32.totalorder %s2154_s20, 1 }
   0xd   : > { %p2238_p6 = por %p150_p3, %p55_p0  ;;  %p157_p7 = scmp.lt.s32.totalorder %s2154_s20, 3 }
   0xe   : > { %s2915_s25 = scalar_select %p2233_p4, 1, 0 }
   0xf   : > { %s2916_s26 = scalar_select %p2238_p6, 1, 0 }
  0x10   : > { %p2243_p8 = pnand %p1505_p5, %p157_p7  ;;  %s2156_s28 = smov [#allocation6]  }
  0x11   : > { %s169_s29 = sshll.u32 %s2156_s28, 4  ;;  %s33_s5 = sadd.s32 1, %s2150_s19  ;;  %s170_s29 = int_to_ptr.vmem [resolvable:$true] %s169_s29 }
  0x12   : > { %s2917_s27 = scalar_select %p2243_p8, 1, 0 }
  0x13   : > { %p1772_p9 = pneg %p2243_p8  ;;  %s2010_s8 = scalar_lea.hbm %s2905_s1, 3072 }
  0x14   : > { %p2011_p12 = scmp.ne.s32.totalorder %s2905_s1, %s2010_s8  ;;  %p2017_p5 = scmp.lt.u32.totalorder %s2010_s8, %s2905_s1 }
  0x15   : > { %p2252_p11 = pnand %p1772_p9, %p2223_p1 }
  0x17   : > { %p2012_p13 = pneg %p2252_p11 }
  0x19   : > { %p2013_p0 = pnand %p2012_p13, %p2011_p12 }
  0x1b   : > { %p2014_p3 = pneg %p2013_p0 }
  0x1d   : > { %p2019_p7 = pnand %p2017_p5, %p2014_p3 }
  0x1f   : > { %2022 = shalt.err (!%p2019_p7)
}
  0x20   : > { %s2023_s13 = scalar_lea.vmem %s170_s29, 3072  ;;  %p2031_p1 = scmp.lt.s32.totalorder %s170_s29, %s170_s29 }
  0x21   : > { %p2024_p9 = scmp.ne.s32.totalorder %s170_s29, %s2023_s13  ;;  %p2032_p4 = scmp.lt.s32.totalorder %s2023_s13, %s2023_s13 }
  0x23   : > { %p2026_p10 = pnand %p2024_p9, %p2012_p13  ;;  %p2033_p8 = por %p2032_p4, %p2031_p1 }
  0x25   : > { %p2027_p6 = pneg %p2026_p10 }
  0x27   : > { %p2034_p2 = pnand %p2033_p8, %p2027_p6 }
  0x29   : > { %2037 = shalt.err (!%p2034_p2)
}
  0x2a   : > { %s2157_s14 = smov 64   ;;  %s2158_s21 = smov 4  }
  0x2b   : > { %1775 = dma.hbm_to_vmem [thread:$0]  (!%p2252_p11), %s2905_s1, 3072, %s170_s29, [#allocation7], %s2157_s14, %s2157_s14, %s2158_s21  }
  0x2c   : > { %p35_p1 = scmp.ge.s32.totalorder %s33_s5, 2  ;;  %s42_s6 = sadd.s32 1, %s2142_s17 }
  0x2d   : > { %p49_p2 = scmp.ne.s32.totalorder %s2142_s17, %s2138_s16  ;;  %p50_p4 = scmp.eq.s32.totalorder %s2154_s20, 0 }
  0x2e   : > { %s2934_s5 = smov (%p35_p1, %s33_s5), 0  ;;  %p2920_p8 = scmp.ne.s32.totalorder %s2914_s24, 0 }
  0x2f   : > { %p2282_p6 = por %p50_p4, %p49_p2  ;;  %s37_s8 = ssub.s32 %s2150_s19, %s2934_s5 }
  0x30   : > { %p2288_p10 = por %p2920_p8, %p49_p2  ;;  %p1785_p12 = scmp.lt.s32.totalorder %s2154_s20, 2 }
  0x31   : > { %p40_p11 = scmp.eq.s32.totalorder %s37_s8, 0  ;;  %s189_s29 = sand.u32 1, %s2142_s17  }
  0x32   : > { %s1508_s9 = sshll.u32 %s189_s29, 7  ;;  %s1562_s11 = sshll.u32 %s2150_s19, 11 }
  0x33   : > { %s2297_s10 = scalar_select %p40_p11, %s2142_s17, %s42_s6  }
  0x34   : > { %s2303_s22 = scalar_lea.hbm %s2904_s0, %s1562_s11  ;;  %s193_s24 = scalar_lea.vmem [#allocation3], %s1508_s9 }
  0x35   : > { %s202_s28 = sshll.u32 %s193_s24, 4  ;;  %p2309_p13 = pnand %p1785_p12, %p2282_p6  ;;  %s2305_s28 = int_to_ptr.vmem [resolvable:$true] %s202_s28 }
  0x36   : > { %s2313_s6 = scalar_lea.sflag [#allocation4], %s189_s29  ;;  %s2038_s12 = scalar_lea.hbm %s2303_s22, 2048 }
  0x37   : > { %p2039_p0 = scmp.ne.s32.totalorder %s2303_s22, %s2038_s12  ;;  %p2040_p3 = pneg %p2309_p13 }
  0x38   : > { %s2043_s7 = scalar_lea.hbm %s2904_s0, 4096  ;;  %p2044_p9 = scmp.lt.u32.totalorder %s2303_s22, %s2904_s0 }
  0x39   : > { %p2041_p5 = pnand %p2040_p3, %p2039_p0  ;;  %p2045_p1 = scmp.lt.u32.totalorder %s2043_s7, %s2038_s12 }
  0x3a   : > { %p2047_p4 = scmp.lt.u32.totalorder %s2038_s12, %s2303_s22 }
  0x3b   : > { %p2042_p7 = pneg %p2041_p5  ;;  %p2046_p2 = por %p2045_p1, %p2044_p9 }
  0x3d   : > { %p2048_p6 = por %p2047_p4, %p2046_p2 }
  0x3f   : > { %p2049_p8 = pnand %p2048_p6, %p2042_p7 }
  0x41   : > { %2052 = shalt.err (!%p2049_p8)
}
  0x42   : > { %s2053_s29 = scalar_lea.vmem %s2305_s28, 2048  ;;  %s2159_s9 = smov [#allocation3]  }
  0x43   : > { %p2054_p12 = scmp.ne.s32.totalorder %s2305_s28, %s2053_s29  ;;  %s2058_s11 = sshll.u32 %s2159_s9, 4  ;;  %s2059_s11 = int_to_ptr.vmem [resolvable:$false] %s2058_s11 }
  0x44   : > { %s2060_s13 = scalar_lea.vmem %s2059_s11, 4096  ;;  %p2061_p5 = scmp.lt.s32.totalorder %s2305_s28, %s2059_s11 }
  0x45   : > { %p2056_p11 = pnand %p2054_p12, %p2040_p3  ;;  %p2062_p9 = scmp.lt.s32.totalorder %s2060_s13, %s2053_s29 }
  0x47   : > { %p2057_p0 = pneg %p2056_p11  ;;  %p2063_p1 = por %p2062_p9, %p2061_p5 }
  0x49   : > { %p2064_p2 = pnand %p2063_p1, %p2057_p0 }
  0x4b   : > { %2067 = shalt.err (!%p2064_p2)
}
  0x4c   : > { %1779 = dma.hbm_to_vmem [thread:$0]  (!%p2309_p13), %s2303_s22, 2048, %s2305_s28, %s2313_s6, %s2157_s14, %s2157_s14, %s2158_s21  }
  0x4d   : > { %p2923_p3 = scmp.ne.s32.totalorder %s2917_s27, 0 }
  0x4e   : > { %s2347_s12 = sand.u32 (!%p2923_p3), 1, %s2138_s16   ;;  %p2924_p7 = scmp.ne.s32.totalorder (!%p2923_p3), %s2915_s25, 0 }
  0x4f   : > { %214 = sbr.rel (%p2923_p3) target bundleno = 511 (0x1ff), region = 36  ;;  %s1512_s7 = sshll.u32 (!%p2923_p3), %s2347_s12, 7 }
  0x50   : > { %s217_s24 = scalar_lea.sflag (!%p2923_p3), [#allocation4], %s2347_s12  ;;  %s2351_s29 = scalar_lea.vmem (!%p2923_p3), [#allocation3], %s1512_s7 }
  0x56   : > { %2121 = dma.done.wait (%p2924_p7), %s217_s24, 2048  }
  0x57   : > { %2123 = vsyncadd (%p2924_p7), %s217_s24, 4294965248  ;;  %p2925_p13 = scmp.ne.s32.totalorder %s2913_s23, 0 }
  0x59   : > { %2125 = dma.done.wait (%p2925_p13), [#allocation7], 3072  }
  0x5a   : > { %2127 = vsyncadd (%p2925_p13), [#allocation7], 4294964224  ;;  %v1842_v0 = vld [vmem:[#allocation6 + $0x40] sm:$0xff]   ;;  %v1844_v2 = vld [vmem:[#allocation6 + $0x48] sm:$0xff]   ;;  %v2160_v23 = vmov 0   ;;  %s1514_s27 = sshll.u32 %s2347_s12, 8 }
  0x5b   : > { %v1843_v1 = vld [vmem:[#allocation6] sm:$0xff]   ;;  %1564 = vmatprep.subr.bf16.mxu0 %v1842_v0  ;;  %1748 = vmatprep.subr.bf16.mxu1 %v1842_v0  ;;  %v1845_v3 = vld [vmem:[#allocation6 + $0x8] sm:$0xff]   ;;  %v1846_v4 = vld [vmem:[#allocation6 + $0x50] sm:$0xff]   ;;  %s2543_s22 = scalar_lea.vmem [#allocation8], %s1514_s27  ;;  %s1563_s28 = sshll.u32 %s2146_s18, 12 }
  0x5c   : > { %1565 = vmatpush3.bf16.msra.mxu0 %v1843_v1  ;;  %1756 = vmatpush3.bf16.msra.mxu1 %v1843_v1  ;;  %v1847_v5 = vld [vmem:[#allocation6 + $0x10] sm:$0xff]   ;;  %v1848_v6 = vld [vmem:[#allocation6 + $0x58] sm:$0xff]   ;;  %v1850_v8 = vld [vmem:[#allocation6 + $0x60] sm:$0xff]   ;;  %s1406_s8 = sshll.u32 %s2543_s22, 4  ;;  %s2850_s11 = scalar_lea.hbm %s2908_s4, %s1563_s28  ;;  %s2852_s8 = int_to_ptr.vmem [resolvable:$true] %s1406_s8 }
  0x5d   : > { %1566 = vmatprep.subr.bf16.mxu0 %v1844_v2  ;;  %1749 = vmatprep.subr.bf16.mxu1 %v1844_v2  ;;  %v1849_v7 = vld [vmem:[#allocation6 + $0x18] sm:$0xff]   ;;  %v1851_v9 = vld [vmem:[#allocation6 + $0x20] sm:$0xff]   ;;  %v1852_v10 = vld [vmem:[#allocation6 + $0x68] sm:$0xff]   ;;  %s1391_s18 = scalar_lea.sflag [#allocation5], %s2347_s12  ;;  %s2068_s13 = scalar_lea.vmem %s2852_s8, 4096 }
  0x5e   : > { %v1858_v11 = vld [vmem:[%s2351_s29] sm:$0xff]   ;;  %v1853_v13 = vld [vmem:[#allocation6 + $0x28] sm:$0xff]   ;;  %v1854_v14 = vld [vmem:[#allocation6 + $0x70] sm:$0xff]   ;;  %p2069_p4 = scmp.ne.s32.totalorder %s2852_s8, %s2068_s13  ;;  %s2161_s7 = smov [#allocation8]  }
  0x5f   : > { %v2363_v12 = vld [vmem:[%s2351_s29 + $0x60] sm:$0xff]   ;;  %702 = vmatprep.mubr.bf16.mxu0 %v1858_v11  ;;  %v1855_v15 = vld [vmem:[#allocation6 + $0x30] sm:$0xff]   ;;  %v1856_v16 = vld [vmem:[#allocation6 + $0x78] sm:$0xff]   ;;  %s2072_s24 = sshll.u32 %s2161_s7, 4  ;;  %s2073_s24 = int_to_ptr.vmem [resolvable:$false] %s2072_s24 }
  0x60   : > { %1567 = vmatpush3.bf16.msra.mxu0 %v1845_v3  ;;  %1757 = vmatpush3.bf16.msra.mxu1 %v1845_v3  ;;  %v1857_v17 = vld [vmem:[#allocation6 + $0x38] sm:$0xff]   ;;  %v1861_v18 = vld [vmem:[#allocation6 + $0x80] sm:$0xff]   ;;  %v1862_v20 = vld [vmem:[#allocation6 + $0x88] sm:$0xff]   ;;  %p2070_p6 = pnand %p2069_p4, %p2288_p10  ;;  %p2075_p12 = scmp.lt.s32.totalorder %s2852_s8, %s2073_s24 }
  0x61   : > { %1568 = vmatprep.subr.bf16.mxu0 %v1846_v4  ;;  %1750 = vmatprep.subr.bf16.mxu1 %v1846_v4  ;;  %v2367_v19 = vld [vmem:[%s2351_s29 + $0x58] sm:$0xff]   ;;  %v1863_v21 = vld [vmem:[%s2351_s29 + $0x8] sm:$0xff]   ;;  %v1865_v24 = vld [vmem:[#allocation6 + $0x90] sm:$0xff]  }
  0x62   : > { %798 = vmatprep.mubr.bf16.mxu1 %v2363_v12  ;;  %v2371_v22 = vld [vmem:[%s2351_s29 + $0x68] sm:$0xff]   ;;  %v1867_v25 = vld [vmem:[%s2351_s29 + $0x10] sm:$0xff]   ;;  %v1866_v26 = vld [vmem:[#allocation6 + $0x98] sm:$0xff]   ;;  %p2071_p8 = pneg %p2070_p6 }
  0x63   : > { %v1868_v27 = vld [vmem:[%s2351_s29 + $0x70] sm:$0xff]   ;;  %v1869_v28 = vld [vmem:[#allocation6 + $0xa0] sm:$0xff]   ;;  %v1871_v29 = vld [vmem:[%s2351_s29 + $0x18] sm:$0xff]  }
  0x64   : > { %1569 = vmatpush3.bf16.msra.mxu0 %v1847_v5  ;;  %1758 = vmatpush3.bf16.msra.mxu1 %v1847_v5  ;;  %v1870_v30 = vld [vmem:[#allocation6 + $0xa8] sm:$0xff]   ;;  %v1872_v31 = vld [vmem:[%s2351_s29 + $0x78] sm:$0xff]   ;;  %v1873_v32 = vld [vmem:[#allocation6 + $0xb0] sm:$0xff]  }
  0x65   : > { %1570 = vmatprep.subr.bf16.mxu0 %v1848_v6  ;;  %1751 = vmatprep.subr.bf16.mxu1 %v1848_v6  ;;  %v1875_v33 = vld [vmem:[%s2351_s29 + $0x20] sm:$0xff]   ;;  %v1874_v34 = vld [vmem:[#allocation6 + $0xb8] sm:$0xff]   ;;  %v1876_v35 = vld [vmem:[%s2351_s29 + $0x28] sm:$0xff]  }
  0x66   : > { %v1877_v36 = vld [vmem:[%s2351_s29 + $0x30] sm:$0xff]   ;;  %v1878_v37 = vld [vmem:[%s2351_s29 + $0x38] sm:$0xff]   ;;  %v1879_v38 = vld [vmem:[%s2351_s29 + $0x40] sm:$0xff]  }
  0x67   : > { %v1880_v39 = vld [vmem:[%s2351_s29 + $0x48] sm:$0xff]   ;;  %v1881_v40 = vld [vmem:[%s2351_s29 + $0x50] sm:$0xff]   ;;  %s2074_s29 = scalar_lea.vmem %s2073_s24, 8192 }
  0x68   : > { %1571 = vmatpush3.bf16.msra.mxu0 %v1849_v7  ;;  %1759 = vmatpush3.bf16.msra.mxu1 %v1849_v7  ;;  %p2076_p11 = scmp.lt.s32.totalorder %s2074_s29, %s2068_s13 }
  0x69   : > { %1572 = vmatprep.subr.bf16.mxu0 %v1850_v8  ;;  %1752 = vmatprep.subr.bf16.mxu1 %v1850_v8 }
  0x6a   : > { %p2077_p0 = por %p2076_p11, %p2075_p12 }
  0x6c   : > { %1573 = vmatpush3.bf16.msra.mxu0 %v1851_v9  ;;  %1760 = vmatpush3.bf16.msra.mxu1 %v1851_v9  ;;  %p2078_p5 = pnand %p2077_p0, %p2071_p8 }
  0x6d   : > { %1574 = vmatprep.subr.bf16.mxu0 %v1852_v10  ;;  %1753 = vmatprep.subr.bf16.mxu1 %v1852_v10 }
  0x70   : > { %1575 = vmatpush3.bf16.msra.mxu0 %v1853_v13  ;;  %1761 = vmatpush3.bf16.msra.mxu1 %v1853_v13 }
  0x71   : > { %1576 = vmatprep.subr.bf16.mxu0 %v1854_v14  ;;  %1754 = vmatprep.subr.bf16.mxu1 %v1854_v14 }
  0x74   : > { %1577 = vmatpush3.bf16.msra.mxu0 %v1855_v15  ;;  %1762 = vmatpush3.bf16.msra.mxu1 %v1855_v15 }
  0x75   : > { %1578 = vmatprep.subr.bf16.mxu0 %v1856_v16  ;;  %1755 = vmatprep.subr.bf16.mxu1 %v1856_v16 }
  0x78   : > { %1579 = vmatpush3.bf16.msra.mxu0 %v1857_v17  ;;  %1763 = vmatpush3.bf16.msra.mxu1 %v1857_v17 }
  0x79   : > { %1700 = vmatprep.subr.bf16.mxu1 %v1861_v18 }
  0x7b   : > { %703 = vmatmul.mubr.bf16.vlgmr.msra.gmra.mrb[0].mxu0 %v2160_v23  ;;  %799 = vmatmul.mubr.bf16.vlgmr.msra.gmra.mrb[0].mxu1 %v2367_v19 }
  0x7c   : > { %1701 = vmatpush3.bf16.msra.mxu1 %v1861_v18  ;;  %710 = vmatprep.mubr.bf16.mxu0 %v1863_v21 }
  0x7d   : > { %1702 = vmatprep.subr.bf16.mxu1 %v1862_v20  ;;  %806 = vmatprep.mubr.bf16.mxu1 %v2371_v22 }
  0x80   : > { %1703 = vmatpush3.bf16.msra.mxu1 %v1862_v20 }
  0x81   : > { %1704 = vmatprep.subr.bf16.mxu1 %v1865_v24 }
  0x83   : > { %711 = vmatmul.mubr.bf16.gmra.mrb[4].mxu0 %v1858_v11  ;;  %807 = vmatmul.mubr.bf16.gmra.mrb[4].mxu1 %v2363_v12 }
  0x84   : > { %1705 = vmatpush3.bf16.msra.mxu1 %v1865_v24  ;;  %718 = vmatprep.mubr.bf16.mxu0 %v1867_v25 }
  0x85   : > { %1706 = vmatprep.subr.bf16.mxu1 %v1866_v26  ;;  %814 = vmatprep.mubr.bf16.mxu1 %v1868_v27 }
  0x88   : > { %1707 = vmatpush3.bf16.msra.mxu1 %v1866_v26 }
  0x89   : > { %1708 = vmatprep.subr.bf16.mxu1 %v1869_v28 }
  0x8b   : > { %719 = vmatmul.mubr.bf16.gmra.mrb[8].mxu0 %v1863_v21  ;;  %815 = vmatmul.mubr.bf16.gmra.mrb[8].mxu1 %v2371_v22 }
  0x8c   : > { %1709 = vmatpush3.bf16.msra.mxu1 %v1869_v28  ;;  %726 = vmatprep.mubr.bf16.mxu0 %v1871_v29 }
  0x8d   : > { %1710 = vmatprep.subr.bf16.mxu1 %v1870_v30  ;;  %822 = vmatprep.mubr.bf16.mxu1 %v1872_v31 }
  0x90   : > { %1711 = vmatpush3.bf16.msra.mxu1 %v1870_v30 }
  0x91   : > { %1712 = vmatprep.subr.bf16.mxu1 %v1873_v32 }
  0x93   : > { %727 = vmatmul.mubr.bf16.gmra.mrb[12].mxu0 %v1867_v25  ;;  %823 = vmatmul.mubr.bf16.gmra.mrb[12].mxu1 %v1868_v27 }
  0x94   : > { %1713 = vmatpush3.bf16.msra.mxu1 %v1873_v32  ;;  %734 = vmatprep.mubr.bf16.mxu0 %v1875_v33 }
  0x95   : > { %1714 = vmatprep.subr.bf16.mxu1 %v1874_v34  ;;  %1716 = vmatprep.mubr.bf16.mxu1 %v1863_v21 }
  0x98   : > { %1715 = vmatpush3.bf16.msra.mxu1 %v1874_v34 }
  0x9b   : > { %735 = vmatmul.mubr.bf16.gmra.mrb[16].mxu0 %v1871_v29  ;;  %1717 = vmatmul.mubr.bf16.vlgmr.msra.gmra.mrb[16].mxu1 %v1867_v25 }
  0x9c   : > { %742 = vmatprep.mubr.bf16.mxu0 %v1876_v35  ;;  %1720 = vmatprep.mubr.bf16.mxu1 %v1871_v29 }
  0xa3   : > { %743 = vmatmul.mubr.bf16.gmra.mrb[20].mxu0 %v1875_v33  ;;  %1721 = vmatmul.mubr.bf16.gmra.mrb[20].mxu1 %v1875_v33 }
  0xa4   : > { %750 = vmatprep.mubr.bf16.mxu0 %v1877_v36  ;;  %1724 = vmatprep.mubr.bf16.mxu1 %v1876_v35 }
  0xab   : > { %751 = vmatmul.mubr.bf16.gmra.mrb[24].mxu0 %v1876_v35  ;;  %1725 = vmatmul.mubr.bf16.gmra.mrb[24].mxu1 %v1877_v36 }
  0xac   : > { %758 = vmatprep.mubr.bf16.mxu0 %v1878_v37  ;;  %1728 = vmatprep.mubr.bf16.mxu1 %v1878_v37 }
  0xb3   : > { %759 = vmatmul.mubr.bf16.gmra.mrb[28].mxu0 %v1877_v36  ;;  %1729 = vmatmul.mubr.bf16.gmra.mrb[28].mxu1 %v1879_v38 }
  0xb4   : > { %766 = vmatprep.mubr.bf16.mxu0 %v1879_v38  ;;  %1732 = vmatprep.mubr.bf16.mxu1 %v1880_v39 }
  0xbb   : > { %767 = vmatmul.mubr.bf16.gmra.mrb[32].mxu0 %v1878_v37  ;;  %1733 = vmatmul.mubr.bf16.gmra.mrb[32].mxu1 %v1881_v40 }
  0xbc   : > { %774 = vmatprep.mubr.bf16.mxu0 %v1880_v39  ;;  %1736 = vmatprep.mubr.bf16.mxu1 %v2367_v19 }
  0xc3   : > { %775 = vmatmul.mubr.bf16.gmra.mrb[36].mxu0 %v1879_v38  ;;  %1737 = vmatmul.mubr.bf16.gmra.mrb[36].mxu1 %v2363_v12 }
  0xc4   : > { %782 = vmatprep.mubr.bf16.mxu0 %v1881_v40  ;;  %1740 = vmatprep.mubr.bf16.mxu1 %v2371_v22 }
  0xcb   : > { %783 = vmatmul.mubr.bf16.gmra.mrb[40].mxu0 %v1880_v39  ;;  %1741 = vmatmul.mubr.bf16.gmra.mrb[40].mxu1 %v1868_v27 }
  0xcc   : > { %790 = vmatprep.mubr.bf16.mxu0 %v2367_v19  ;;  %1744 = vmatprep.mubr.bf16.mxu1 %v1872_v31 }
  0xd3   : > { %791 = vmatmul.mubr.bf16.gmra.mrb[44].mxu0 %v1881_v40  ;;  %1745 = vmatmul.mubr.bf16.gmra.mrb[44].mxu1 %v2160_v23 }
 0x14e   : > { %v1580_v41 = vpop.f32.mrb[0].mxu0  ;;  %v1652_v42 = vpop.f32.mrb[0].mxu1 }
 0x14f   : > { %v1581_v43 = vpop.f32.mrb[1].mxu0  ;;  %v1653_v44 = vpop.f32.mrb[1].mxu1 }
 0x150   : > { %v1582_v45 = vadd.f32 %v1581_v43, %v1580_v41  ;;  %v2394_v46 = vadd.f32 %v1653_v44, %v1652_v42  ;;  %v1583_v47 = vpop.f32.mrb[2].mxu0  ;;  %v1655_v48 = vpop.f32.mrb[2].mxu1 }
 0x151   : > { %v1584_v49 = vpop.f32.mrb[3].mxu0  ;;  %v1656_v50 = vpop.f32.mrb[3].mxu1 }
 0x152   : > { %v1585_v51 = vadd.f32 %v1584_v49, %v1583_v47  ;;  %v2396_v52 = vadd.f32 %v1656_v50, %v1655_v48 }
 0x156   : > { %v1586_v53 = vpop.f32.mrb[4].mxu0  ;;  %v1658_v54 = vpop.f32.mrb[4].mxu1 }
 0x157   : > { %v1587_v55 = vpop.f32.mrb[5].mxu0  ;;  %v1659_v56 = vpop.f32.mrb[5].mxu1 }
 0x158   : > { %v1588_v57 = vadd.f32 %v1587_v55, %v1586_v53  ;;  %v2398_v58 = vadd.f32 %v1659_v56, %v1658_v54  ;;  %v1589_v59 = vpop.f32.mrb[6].mxu0  ;;  %v1661_v60 = vpop.f32.mrb[6].mxu1 }
 0x159   : > { %v1590_v61 = vpop.f32.mrb[7].mxu0  ;;  %v1662_v62 = vpop.f32.mrb[7].mxu1 }
 0x15a   : > { %v1591_v63 = vadd.f32 %v1590_v61, %v1589_v59  ;;  %v2400_v0 = vadd.f32 %v1662_v62, %v1661_v60 }
 0x15e   : > { %v1592_v1 = vpop.f32.mrb[8].mxu0  ;;  %v1664_v2 = vpop.f32.mrb[8].mxu1 }
 0x15f   : > { %v1593_v3 = vpop.f32.mrb[9].mxu0  ;;  %v1665_v4 = vpop.f32.mrb[9].mxu1 }
 0x160   : > { %v1594_v5 = vadd.f32 %v1593_v3, %v1592_v1  ;;  %v2402_v6 = vadd.f32 %v1665_v4, %v1664_v2  ;;  %v1595_v7 = vpop.f32.mrb[10].mxu0  ;;  %v1667_v8 = vpop.f32.mrb[10].mxu1 }
 0x161   : > { %v1596_v9 = vpop.f32.mrb[11].mxu0  ;;  %v1668_v10 = vpop.f32.mrb[11].mxu1 }
 0x162   : > { %v1597_v11 = vadd.f32 %v1596_v9, %v1595_v7  ;;  %v2404_v12 = vadd.f32 %v1668_v10, %v1667_v8 }
 0x166   : > { %v1598_v13 = vpop.f32.mrb[12].mxu0  ;;  %v1670_v14 = vpop.f32.mrb[12].mxu1 }
 0x167   : > { %v1599_v15 = vpop.f32.mrb[13].mxu0  ;;  %v1671_v16 = vpop.f32.mrb[13].mxu1 }
 0x168   : > { %v1600_v17 = vadd.f32 %v1599_v15, %v1598_v13  ;;  %v2406_v18 = vadd.f32 %v1671_v16, %v1670_v14  ;;  %v1601_v19 = vpop.f32.mrb[14].mxu0  ;;  %v1673_v20 = vpop.f32.mrb[14].mxu1 }
 0x169   : > { %v1602_v21 = vpop.f32.mrb[15].mxu0  ;;  %v1674_v22 = vpop.f32.mrb[15].mxu1 }
 0x16a   : > { %v1603_v23 = vadd.f32 %v1602_v21, %v1601_v19  ;;  %v2408_v24 = vadd.f32 %v1674_v22, %v1673_v20 }
 0x16e   : > { %v1604_v25 = vpop.f32.mrb[16].mxu0  ;;  %v1718_v26 = vpop.f32.mrb[16].mxu1 }
 0x16f   : > { %v2410_v27 = vadd.f32 %v1718_v26, %v1588_v57  ;;  %v1605_v28 = vpop.f32.mrb[17].mxu0  ;;  %v865_v29 = vpop.f32.mrb[17].mxu1 }
 0x170   : > { %v1606_v30 = vadd.f32 %v1605_v28, %v1604_v25  ;;  %v2412_v31 = vadd.f32 %v1582_v45, %v865_v29  ;;  %v1607_v32 = vpop.f32.mrb[18].mxu0  ;;  %v1719_v33 = vpop.f32.mrb[18].mxu1 }
 0x171   : > { %v994_v34 = vmin.f32 %v2410_v27, 20.0  ;;  %v2415_v35 = vadd.f32 %v1719_v33, %v1591_v63  ;;  %v1608_v36 = vpop.f32.mrb[19].mxu0  ;;  %v868_v37 = vpop.f32.mrb[19].mxu1 }
 0x172   : > { %v992_v38 = vmin.f32 %v2412_v31, 20.0  ;;  %v2418_v39 = vadd.f32 %v1608_v36, %v1607_v32  ;;  %v2420_v40 = vadd.f32 %v1585_v51, %v868_v37 }
 0x173   : > { %v1028_v41 = vmul.f32 1.442695, %v994_v34  ;;  %v995_v42 = vmin.f32 %v2415_v35, 20.0 }
 0x174   : > { %v1024_v43 = vmul.f32 1.442695, %v992_v38  ;;  %v993_v44 = vmin.f32 %v2420_v40, 20.0 }
 0x175   : > { %1882 = vpow2.f32 %v1028_v41  ;;  %v1030_v45 = vmul.f32 1.442695, %v995_v42 }
 0x176   : > { %1884 = vpow2.f32 %v1024_v43  ;;  %v1026_v47 = vmul.f32 1.442695, %v993_v44  ;;  %v1610_v48 = vpop.f32.mrb[20].mxu0  ;;  %v1722_v49 = vpop.f32.mrb[20].mxu1 }
 0x177   : > { %1886 = vpow2.f32 %v1030_v45  ;;  %v2424_v50 = vadd.f32 %v1722_v49, %v1600_v17  ;;  %v1611_v53 = vpop.f32.mrb[21].mxu0  ;;  %v881_v54 = vpop.f32.mrb[21].mxu1 }
 0x178   : > { %1888 = vpow2.f32 %v1026_v47  ;;  %v1612_v51 = vadd.f32 %v1611_v53, %v1610_v48  ;;  %v2426_v55 = vadd.f32 %v1594_v5, %v881_v54  ;;  %v1613_v56 = vpop.f32.mrb[22].mxu0  ;;  %v1723_v57 = vpop.f32.mrb[22].mxu1 }
 0x179   : > { %v998_v59 = vmin.f32 %v2424_v50, 20.0  ;;  %v2429_v60 = vadd.f32 %v1723_v57, %v1603_v23  ;;  %v1614_v61 = vpop.f32.mrb[23].mxu0  ;;  %v884_v62 = vpop.f32.mrb[23].mxu1 }
 0x17a   : > { %v996_v63 = vmin.f32 %v2426_v55, 20.0  ;;  %v1615_v1 = vadd.f32 %v1614_v61, %v1613_v56  ;;  %v2432_v2 = vadd.f32 %v1597_v11, %v884_v62 }
 0x17b   : > { %v1036_v3 = vmul.f32 1.442695, %v998_v59  ;;  %v999_v4 = vmin.f32 %v2429_v60, 20.0 }
 0x17c   : > { %v1032_v7 = vmul.f32 1.442695, %v996_v63  ;;  %v997_v5 = vmin.f32 %v2432_v2, 20.0 }
 0x17d   : > { %1890 = vpow2.f32 %v1036_v3  ;;  %v1038_v8 = vmul.f32 1.442695, %v999_v4 }
 0x17e   : > { %1892 = vpow2.f32 %v1032_v7  ;;  %v1034_v9 = vmul.f32 1.442695, %v997_v5  ;;  %v1616_v10 = vpop.f32.mrb[24].mxu0  ;;  %v1726_v13 = vpop.f32.mrb[24].mxu1 }
 0x17f   : > { %v1883_v14 = vpop.eup %1882  ;;  %1894 = vpow2.f32 %v1038_v8  ;;  %v2436_v15 = vadd.f32 %v1726_v13, %v1612_v51  ;;  %v1617_v16 = vpop.f32.mrb[25].mxu0 }
 0x180   : > { %v897_v17 = vpop.f32.mrb[25].mxu1  ;;  %v1885_v11 = vpop.eup %1884  ;;  %v1090_v19 = vadd.f32 2.0, %v1883_v14  ;;  %1896 = vpow2.f32 %v1034_v9  ;;  %v1618_v20 = vadd.f32 %v1617_v16, %v1616_v10 }
 0x181   : > { %v2438_v21 = vadd.f32 %v1606_v30, %v897_v17  ;;  %v1619_v22 = vpop.f32.mrb[26].mxu0  ;;  %v1727_v23 = vpop.f32.mrb[26].mxu1  ;;  %v1088_v26 = vadd.f32 2.0, %v1885_v11  ;;  %v1002_v28 = vmin.f32 %v2436_v15, 20.0 }
 0x182   : > { %v1887_v25 = vpop.eup %1886  ;;  %v2441_v29 = vadd.f32 %v1727_v23, %v1615_v1  ;;  %v1620_v32 = vpop.f32.mrb[27].mxu0  ;;  %v2443_v36 = vmul.f32 %v1883_v14, %v1090_v19 }
 0x183   : > { %v900_v33 = vpop.f32.mrb[27].mxu1  ;;  %v1889_v34 = vpop.eup %1888  ;;  %v1091_v37 = vadd.f32 2.0, %v1887_v25  ;;  %v1000_v38 = vmin.f32 %v2438_v21, 20.0  ;;  %v1621_v41 = vadd.f32 %v1620_v32, %v1619_v22  ;;  %v2446_v42 = vmul.f32 %v1885_v11, %v1088_v26 }
 0x184   : > { %v1089_v30 = vadd.f32 2.0, %v1889_v34  ;;  %v1044_v43 = vmul.f32 1.442695, %v1002_v28  ;;  %v1003_v44 = vmin.f32 %v2441_v29, 20.0  ;;  %v1154_v45 = vadd.f32 2.0, %v2443_v36 }
 0x185   : > { %v2450_v47 = vmul.f32 %v1887_v25, %v1091_v37  ;;  %v2453_v48 = vadd.f32 %v2418_v39, %v900_v33  ;;  %v1152_v49 = vadd.f32 2.0, %v2446_v42  ;;  %v1040_v51 = vmul.f32 1.442695, %v1000_v38 }
 0x186   : > { %v2456_v53 = vmul.f32 %v1889_v34, %v1089_v30  ;;  %1898 = vpow2.f32 %v1044_v43  ;;  %v1622_v57 = vpop.f32.mrb[28].mxu0  ;;  %v1730_v59 = vpop.f32.mrb[28].mxu1  ;;  %v1046_v63 = vmul.f32 1.442695, %v1003_v44 }
 0x187   : > { %1900 = vrcp.f32 %v1154_v45  ;;  %v1155_v54 = vadd.f32 2.0, %v2450_v47  ;;  %v1001_v56 = vmin.f32 %v2453_v48, 20.0  ;;  %v1891_v61 = vpop.eup %1890  ;;  %v1623_v39 = vpop.f32.mrb[29].mxu0 }
 0x188   : > { %1902 = vrcp.f32 %v1152_v49  ;;  %v1153_v62 = vadd.f32 2.0, %v2456_v53  ;;  %v913_v1 = vpop.f32.mrb[29].mxu1  ;;  %v1893_v3 = vpop.eup %1892  ;;  %v1094_v4 = vadd.f32 2.0, %v1891_v61  ;;  %v1624_v5 = vadd.f32 %v1623_v39, %v1622_v57 }
 0x189   : > { %1904 = vrcp.f32 %v1155_v54  ;;  %v1042_v7 = vmul.f32 1.442695, %v1001_v56  ;;  %v1625_v8 = vpop.f32.mrb[30].mxu0  ;;  %v1731_v9 = vpop.f32.mrb[30].mxu1  ;;  %v1092_v13 = vadd.f32 2.0, %v1893_v3  ;;  %v2461_v14 = vadd.f32 %v1618_v20, %v913_v1 }
 0x18a   : > { %v1895_v10 = vpop.eup %1894  ;;  %1906 = vrcp.f32 %v1153_v62  ;;  %v1626_v16 = vpop.f32.mrb[31].mxu0  ;;  %v2463_v19 = vmul.f32 %v1891_v61, %v1094_v4  ;;  %v2465_v23 = vadd.f32 %v1730_v59, %v1624_v5 }
 0x18b   : > { %v916_v17 = vpop.f32.mrb[31].mxu1  ;;  %v1897_v11 = vpop.eup %1896  ;;  %v1095_v22 = vadd.f32 2.0, %v1895_v10  ;;  %1908 = vpow2.f32 %v1040_v51  ;;  %v2467_v25 = vmul.f32 %v1893_v3, %v1092_v13  ;;  %v1004_v28 = vmin.f32 %v2461_v14, 20.0  ;;  %v2499_v13 = vld [vmem:[%s2906_s2] ss:$0 sm:$0xff] }
 0x18c   : > { %v1093_v26 = vadd.f32 2.0, %v1897_v11  ;;  %1910 = vpow2.f32 %v1046_v63  ;;  %v1158_v32 = vadd.f32 2.0, %v2463_v19  ;;  %v1006_v20 = vmin.f32 %v2465_v23, 20.0 }
 0x18d   : > { %v2471_v33 = vmul.f32 %v1895_v10, %v1095_v22  ;;  %1912 = vpow2.f32 %v1042_v7  ;;  %v1156_v34 = vadd.f32 2.0, %v2467_v25  ;;  %v1627_v38 = vadd.f32 %v1626_v16, %v1625_v8 }
 0x18e   : > { %v2475_v37 = vmul.f32 %v1897_v11, %v1093_v26  ;;  %1914 = vrcp.f32 %v1158_v32  ;;  %v1052_v43 = vmul.f32 1.442695, %v1006_v20  ;;  %v2478_v44 = vadd.f32 %v1621_v41, %v916_v17  ;;  %v1628_v45 = vpop.f32.mrb[32].mxu0  ;;  %v2480_v49 = vpop.f32.mrb[32].mxu1  ;;  %v2510_v20 = vld [vmem:[%s2907_s3] ss:$0 sm:$0xff] }
 0x18f   : > { %v1159_v30 = vadd.f32 2.0, %v2471_v33  ;;  %1916 = vrcp.f32 %v1156_v34  ;;  %v1048_v56 = vmul.f32 1.442695, %v1004_v28  ;;  %v2483_v57 = vadd.f32 %v1731_v9, %v1627_v38  ;;  %v1629_v59 = vpop.f32.mrb[33].mxu0  ;;  %v929_v61 = vpop.f32.mrb[33].mxu1 }
 0x190   : > { %v1899_v54 = vpop.eup %1898  ;;  %v1157_v51 = vadd.f32 2.0, %v2475_v37  ;;  %v1005_v39 = vmin.f32 %v2478_v44, 20.0  ;;  %v1630_v1 = vadd.f32 %v1629_v59, %v1628_v45  ;;  %v2486_v41 = vpop.f32.mrb[34].mxu0 }
 0x191   : > { %v1901_v62 = vpop.eup %1900  ;;  %1918 = vrcp.f32 %v1159_v30  ;;  %v1098_v63 = vadd.f32 2.0, %v1899_v54  ;;  %v2488_v3 = vpop.f32.mrb[34].mxu1  ;;  %v1007_v5 = vmin.f32 %v2483_v57, 20.0 }
 0x192   : > { %v1903_v4 = vpop.eup %1902  ;;  %v1218_v7 = vmul.f32 %v1901_v62, %v2443_v36  ;;  %1920 = vrcp.f32 %v1157_v51  ;;  %v2492_v8 = vpop.f32.mrb[35].mxu0  ;;  %v1050_v11 = vmul.f32 1.442695, %v1005_v39 }
 0x193   : > { %v2494_v9 = vpop.f32.mrb[35].mxu1  ;;  %v1905_v10 = vpop.eup %1904  ;;  %v1216_v16 = vmul.f32 %v1903_v4, %v2446_v42  ;;  %v2502_v17 = vmul.f32 %v1899_v54, %v1098_v63  ;;  %1922 = vpow2.f32 %v1052_v43  ;;  %v1054_v28 = vmul.f32 1.442695, %v1007_v5 }
 0x194   : > { %v1907_v36 = vpop.eup %1906  ;;  %v1250_v22 = vmul.f32 %v1218_v7, %v2410_v27  ;;  %v1219_v26 = vmul.f32 %v1905_v10, %v2450_v47  ;;  %1924 = vpow2.f32 %v1048_v56 }
 0x195   : > { %v1909_v32 = vpop.eup %1908  ;;  %v1248_v42 = vmul.f32 %v1216_v16, %v2412_v31  ;;  %v1217_v34 = vmul.f32 %v1907_v36, %v2456_v53  ;;  %v1162_v38 = vadd.f32 2.0, %v2502_v17  ;;  %1926 = vpow2.f32 %v1050_v11 }
 0x196   : > { %v1911_v30 = vpop.eup %1910  ;;  %v1289_v27 = vmul.f32 %v2499_v13, %v1250_v22  ;;  %v1251_v47 = vmul.f32 %v1219_v26, %v2415_v35  ;;  %v1096_v43 = vadd.f32 2.0, %v1909_v32  ;;  %1928 = vpow2.f32 %v1054_v28  ;;  %v2519_v31 = vpop.f32.mrb[36].mxu0 }
 0x197   : > { %v1913_v45 = vpop.eup %1912  ;;  %v1287_v54 = vmul.f32 %v2499_v13, %v1248_v42  ;;  %v1249_v51 = vmul.f32 %v1217_v34, %v2420_v40  ;;  %1930 = vrcp.f32 %v1162_v38  ;;  %v1099_v56 = vadd.f32 2.0, %v1911_v30  ;;  %v2521_v53 = vpop.f32.mrb[36].mxu1 }
 0x198   : > { %v1328_v59 = vadd.f32 %v2510_v20, %v1289_v27  ;;  %v1290_v62 = vmul.f32 %v2499_v13, %v1251_v47  ;;  %v2525_v63 = vmul.f32 %v1909_v32, %v1096_v43  ;;  %v1097_v35 = vadd.f32 2.0, %v1913_v45  ;;  %v2527_v39 = vpop.f32.mrb[37].mxu0  ;;  %v2529_v4 = vpop.f32.mrb[37].mxu1 }
 0x199   : > { %v1915_v7 = vpop.eup %1914  ;;  %v1326_v40 = vadd.f32 %v2510_v20, %v1287_v54  ;;  %v1288_v5 = vmul.f32 %v2499_v13, %v1249_v51  ;;  %v2533_v10 = vmul.f32 %v1911_v30, %v1099_v56  ;;  %v2535_v16 = vadd.f32 %v1630_v1, %v929_v61  ;;  %v2537_v11 = vpop.f32.mrb[38].mxu0 }
 0x19a   : > { %v2539_v36 = vpop.f32.mrb[38].mxu1  ;;  %v1917_v22 = vpop.eup %1916  ;;  %1360 = vst [vmem:[%s2543_s22 + $0x10] sm:$0xff] %v1328_v59  ;;  %v1329_v26 = vadd.f32 %v2510_v20, %v1290_v62  ;;  %v1222_v28 = vmul.f32 %v1915_v7, %v2463_v19  ;;  %v1160_v32 = vadd.f32 2.0, %v2525_v63  ;;  %v2549_v61 = vmul.f32 %v1913_v45, %v1097_v35 }
 0x19b   : > { %v2551_v1 = vpop.f32.mrb[39].mxu0  ;;  %v2553_v42 = vpop.f32.mrb[39].mxu1  ;;  %1358 = vst [vmem:[%s2543_s22] sm:$0xff] %v1326_v40  ;;  %v1327_v38 = vadd.f32 %v2510_v20, %v1288_v5  ;;  %v1220_v30 = vmul.f32 %v1917_v22, %v2467_v25  ;;  %v1163_v27 = vadd.f32 2.0, %v2533_v10  ;;  %v1008_v47 = vmin.f32 %v2535_v16, 20.0 }
 0x19c   : > { %v1919_v34 = vpop.eup %1918  ;;  %1361 = vst [vmem:[%s2543_s22 + $0x18] sm:$0xff] %v1329_v26  ;;  %v1254_v43 = vmul.f32 %v1222_v28, %v2424_v50  ;;  %1932 = vrcp.f32 %v1160_v32  ;;  %v1161_v54 = vadd.f32 2.0, %v2549_v61 }
 0x19d   : > { %v1921_v19 = vpop.eup %1920  ;;  %v1223_v45 = vmul.f32 %v1919_v34, %v2471_v33  ;;  %1359 = vst [vmem:[%s2543_s22 + $0x8] sm:$0xff] %v1327_v38  ;;  %v1252_v56 = vmul.f32 %v1220_v30, %v2426_v55  ;;  %1934 = vrcp.f32 %v1163_v27  ;;  %v1056_v25 = vmul.f32 1.442695, %v1008_v47 }
 0x19e   : > { %v1923_v51 = vpop.eup %1922  ;;  %v1221_v59 = vmul.f32 %v1921_v19, %v2475_v37  ;;  %v1293_v35 = vmul.f32 %v2499_v13, %v1254_v43  ;;  %1936 = vrcp.f32 %v1161_v54  ;;  %v2571_v26 = vpop.f32.mrb[40].mxu0 }
 0x19f   : > { %v1925_v62 = vpop.eup %1924  ;;  %v1255_v7 = vmul.f32 %v1223_v45, %v2429_v60  ;;  %v1102_v50 = vadd.f32 2.0, %v1923_v51  ;;  %v1291_v33 = vmul.f32 %v2499_v13, %v1252_v56  ;;  %1938 = vpow2.f32 %v1056_v25  ;;  %v1742_v55 = vpop.f32.mrb[40].mxu1 }
 0x1a0   : > { %v1927_v40 = vpop.eup %1926  ;;  %v1253_v5 = vmul.f32 %v1221_v59, %v2432_v2  ;;  %v1100_v22 = vadd.f32 2.0, %v1925_v62  ;;  %v1332_v28 = vadd.f32 %v2510_v20, %v1293_v35  ;;  %v2577_v38 = vpop.f32.mrb[41].mxu0 }
 0x1a1   : > { %v1929_v37 = vpop.eup %1928  ;;  %v1294_v32 = vmul.f32 %v2499_v13, %v1255_v7  ;;  %v2575_v34 = vmul.f32 %v1923_v51, %v1102_v50  ;;  %v1101_v60 = vadd.f32 2.0, %v1927_v40  ;;  %v2579_v30 = vpop.f32.mrb[41].mxu1  ;;  %v1330_v27 = vadd.f32 %v2510_v20, %v1291_v33 }
 0x1a2   : > { %v1931_v2 = vpop.eup %1930  ;;  %v1292_v47 = vmul.f32 %v2499_v13, %v1253_v5  ;;  %v2583_v19 = vmul.f32 %v1925_v62, %v1100_v22  ;;  %v1103_v43 = vadd.f32 2.0, %v1929_v37  ;;  %v2585_v45 = vpop.f32.mrb[42].mxu0  ;;  %1364 = vst [vmem:[%s2543_s22 + $0x30] sm:$0xff] %v1332_v28  ;;  %v1633_v5 = vadd.f32 %v2492_v8, %v2486_v41 }
 0x1a3   : > { %v2587_v54 = vpop.f32.mrb[42].mxu1  ;;  %v1333_v51 = vadd.f32 %v2510_v20, %v1294_v32  ;;  %v1226_v56 = vmul.f32 %v1931_v2, %v2502_v17  ;;  %v1166_v59 = vadd.f32 2.0, %v2575_v34  ;;  %v2593_v25 = vmul.f32 %v1927_v40, %v1101_v60  ;;  %v2595_v35 = vpop.f32.mrb[43].mxu0  ;;  %1362 = vst [vmem:[%s2543_s22 + $0x20] sm:$0xff] %v1330_v27 }
 0x1a4   : > { %v2597_v62 = vpop.f32.mrb[43].mxu1  ;;  %v1331_v7 = vadd.f32 %v2510_v20, %v1292_v47  ;;  %v1164_v50 = vadd.f32 2.0, %v2583_v19  ;;  %v2602_v33 = vmul.f32 %v1929_v37, %v1103_v43  ;;  %v1636_v22 = vadd.f32 %v2527_v39, %v2519_v31 }
 0x1a5   : > { %1365 = vst [vmem:[%s2543_s22 + $0x38] sm:$0xff] %v1333_v51  ;;  %v1258_v17 = vmul.f32 %v1226_v56, %v2436_v15  ;;  %1940 = vrcp.f32 %v1166_v59  ;;  %v1165_v40 = vadd.f32 2.0, %v2593_v25  ;;  %v2614_v32 = vadd.f32 %v1633_v5, %v2494_v9 }
 0x1a6   : > { %1363 = vst [vmem:[%s2543_s22 + $0x28] sm:$0xff] %v1331_v7  ;;  %1942 = vrcp.f32 %v1164_v50  ;;  %v1167_v28 = vadd.f32 2.0, %v2602_v33  ;;  %v1639_v37 = vadd.f32 %v2551_v1, %v2537_v11  ;;  %v1933_v41 = vpop.eup %1932  ;;  %v2620_v15 = vadd.f32 %v2480_v49, %v1636_v22  ;;  %v2630_v11 = vpop.f32.mrb[44].mxu0 }
 0x1a7   : > { %v1297_v8 = vmul.f32 %v2499_v13, %v1258_v17  ;;  %1944 = vrcp.f32 %v1165_v40  ;;  %v2623_v60 = vadd.f32 %v1742_v55, %v2398_v58  ;;  %v1935_v31 = vpop.eup %1934  ;;  %v1224_v39 = vmul.f32 %v1933_v41, %v2525_v63  ;;  %v2632_v1 = vpop.f32.mrb[44].mxu1 }
 0x1a8   : > { %1946 = vrcp.f32 %v1167_v28  ;;  %v1009_v9 = vmin.f32 %v2614_v32, 20.0  ;;  %v2628_v2 = vadd.f32 %v2488_v3, %v1639_v37  ;;  %v1937_v27 = vpop.eup %1936  ;;  %v1227_v58 = vmul.f32 %v1935_v31, %v2533_v10  ;;  %v2638_v47 = vpop.f32.mrb[45].mxu0 }
 0x1a9   : > { %v1336_v49 = vadd.f32 %v2510_v20, %v1297_v8  ;;  %v1010_v55 = vmin.f32 %v2620_v15, 20.0  ;;  %v1018_v63 = vmin.f32 %v2623_v60, 20.0  ;;  %v2640_v43 = vpop.f32.mrb[45].mxu1  ;;  %v1939_v3 = vpop.eup %1938  ;;  %v1256_v51 = vmul.f32 %v1224_v39, %v2438_v21 }
 0x1aa   : > { %v1225_v56 = vmul.f32 %v1937_v27, %v2549_v61  ;;  %v1058_v59 = vmul.f32 1.442695, %v1009_v9  ;;  %v1011_v7 = vmin.f32 %v2628_v2, 20.0  ;;  %v2645_v50 = vpop.f32.mrb[46].mxu0  ;;  %v2647_v5 = vpop.f32.mrb[46].mxu1  ;;  %v1259_v10 = vmul.f32 %v1227_v58, %v2441_v29 }
 0x1ab   : > { %1368 = vst [vmem:[%s2543_s22 + $0x50] sm:$0xff] %v1336_v49  ;;  %v1104_v17 = vadd.f32 2.0, %v1939_v3  ;;  %v1060_v40 = vmul.f32 1.442695, %v1010_v55  ;;  %v1076_v22 = vmul.f32 1.442695, %v1018_v63  ;;  %v1295_v37 = vmul.f32 %v2499_v13, %v1256_v51 }
 0x1ac   : > { %v2651_v28 = vpop.f32.mrb[47].mxu0  ;;  %v1257_v21 = vmul.f32 %v1225_v56, %v2453_v48  ;;  %1948 = vpow2.f32 %v1058_v59  ;;  %v1062_v61 = vmul.f32 1.442695, %v1011_v7  ;;  %v2655_v41 = vpop.f32.mrb[47].mxu1  ;;  %v1298_v8 = vmul.f32 %v2499_v13, %v1259_v10 }
 0x1ad   : > { %v2658_v31 = vmul.f32 %v1939_v3, %v1104_v17  ;;  %1950 = vpow2.f32 %v1060_v40  ;;  %v1642_v29 = vadd.f32 %v2577_v38, %v2571_v26  ;;  %v1334_v39 = vadd.f32 %v2510_v20, %v1295_v37 }
 0x1ae   : > { %v1296_v9 = vmul.f32 %v2499_v13, %v1257_v21  ;;  %1952 = vpow2.f32 %v1062_v61  ;;  %v2666_v48 = vadd.f32 %v2394_v46, %v2579_v30  ;;  %v1337_v49 = vadd.f32 %v2510_v20, %v1298_v8 }
 0x1af   : > { %v1941_v27 = vpop.eup %1940  ;;  %v1168_v58 = vadd.f32 2.0, %v2658_v31  ;;  %1954 = vpow2.f32 %v1076_v22  ;;  %v2671_v55 = vadd.f32 %v1642_v29, %v2529_v4  ;;  %1366 = vst [vmem:[%s2543_s22 + $0x40] sm:$0xff] %v1334_v39  ;;  %v2679_v46 = vadd.f32 %v2587_v54, %v2400_v0 }
 0x1b0   : > { %v1943_v26 = vpop.eup %1942  ;;  %v1335_v38 = vadd.f32 %v2510_v20, %v1296_v9  ;;  %v1230_v63 = vmul.f32 %v1941_v27, %v2575_v34  ;;  %v1016_v3 = vmin.f32 %v2666_v48, 20.0  ;;  %1369 = vst [vmem:[%s2543_s22 + $0x58] sm:$0xff] %v1337_v49  ;;  %v1645_v56 = vadd.f32 %v2595_v35, %v2585_v45 }
 0x1b1   : > { %v1945_v30 = vpop.eup %1944  ;;  %v1228_v51 = vmul.f32 %v1943_v26, %v2583_v19  ;;  %1956 = vrcp.f32 %v1168_v58  ;;  %v1012_v4 = vmin.f32 %v2671_v55, 20.0  ;;  %v1019_v0 = vmin.f32 %v2679_v46, 20.0 }
 0x1b2   : > { %v1947_v59 = vpop.eup %1946  ;;  %1367 = vst [vmem:[%s2543_s22 + $0x48] sm:$0xff] %v1335_v38  ;;  %v1262_v34 = vmul.f32 %v1230_v63, %v2465_v23  ;;  %v1229_v7 = vmul.f32 %v1945_v30, %v2593_v25  ;;  %v1072_v10 = vmul.f32 1.442695, %v1016_v3  ;;  %v2693_v40 = vadd.f32 %v1645_v56, %v2553_v42 }
 0x1b3   : > { %v1260_v54 = vmul.f32 %v1228_v51, %v2461_v14  ;;  %v1231_v17 = vmul.f32 %v1947_v59, %v2602_v33  ;;  %v1064_v19 = vmul.f32 1.442695, %v1012_v4  ;;  %v1078_v35 = vmul.f32 1.442695, %v1019_v0 }
 0x1b4   : > { %v1301_v22 = vmul.f32 %v2499_v13, %v1262_v34  ;;  %v1261_v45 = vmul.f32 %v1229_v7, %v2478_v44  ;;  %1958 = vpow2.f32 %v1072_v10  ;;  %v1013_v14 = vmin.f32 %v2693_v40, 20.0 }
 0x1b5   : > { %v1299_v23 = vmul.f32 %v2499_v13, %v1260_v54  ;;  %v1263_v25 = vmul.f32 %v1231_v17, %v2483_v57  ;;  %1960 = vpow2.f32 %v1064_v19  ;;  %v2704_v44 = vadd.f32 %v2396_v52, %v2597_v62 }
 0x1b6   : > { %v1949_v37 = vpop.eup %1948  ;;  %v1340_v33 = vadd.f32 %v2510_v20, %v1301_v22  ;;  %v1300_v42 = vmul.f32 %v2499_v13, %v1261_v45  ;;  %1962 = vpow2.f32 %v1078_v35  ;;  %v1066_v29 = vmul.f32 1.442695, %v1013_v14 }
 0x1b7   : > { %v1951_v21 = vpop.eup %1950  ;;  %v1338_v61 = vadd.f32 %v2510_v20, %v1299_v23  ;;  %v1302_v57 = vmul.f32 %v2499_v13, %v1263_v25  ;;  %v1105_v8 = vadd.f32 2.0, %v1949_v37  ;;  %v1017_v49 = vmin.f32 %v2704_v44, 20.0 }
 0x1b8   : > { %v1953_v39 = vpop.eup %1952  ;;  %1372 = vst [vmem:[%s2543_s22 + $0x70] sm:$0xff] %v1340_v33  ;;  %v1339_v9 = vadd.f32 %v2510_v20, %v1300_v42  ;;  %v1106_v27 = vadd.f32 2.0, %v1951_v21  ;;  %v2713_v52 = vadd.f32 %v2632_v1, %v2406_v18  ;;  %1964 = vpow2.f32 %v1066_v29 }
 0x1b9   : > { %v1955_v62 = vpop.eup %1954  ;;  %1370 = vst [vmem:[%s2543_s22 + $0x60] sm:$0xff] %v1338_v61  ;;  %v1341_v58 = vadd.f32 %v2510_v20, %v1302_v57  ;;  %v2717_v26 = vmul.f32 %v1949_v37, %v1105_v8  ;;  %v1107_v38 = vadd.f32 2.0, %v1953_v39  ;;  %v1074_v30 = vmul.f32 1.442695, %v1017_v49 }
 0x1ba   : > { %1371 = vst [vmem:[%s2543_s22 + $0x68] sm:$0xff] %v1339_v9  ;;  %v2720_v63 = vmul.f32 %v1951_v21, %v1106_v27  ;;  %v1114_v3 = vadd.f32 2.0, %v1955_v62  ;;  %v1022_v51 = vmin.f32 %v2713_v52, 20.0  ;;  %v1648_v56 = vadd.f32 %v2638_v47, %v2630_v11 }
 0x1bb   : > { %v1957_v4 = vpop.eup %1956  ;;  %1373 = vst [vmem:[%s2543_s22 + $0x78] sm:$0xff] %v1341_v58  ;;  %v1169_v18 = vadd.f32 2.0, %v2717_v26  ;;  %v2725_v1 = vmul.f32 %v1953_v39, %v1107_v38  ;;  %v2731_v59 = vadd.f32 %v2402_v6, %v2640_v43  ;;  %1966 = vpow2.f32 %v1074_v30 }
 0x1bc   : > { %v1232_v34 = vmul.f32 %v1957_v4, %v2658_v31  ;;  %v1170_v7 = vadd.f32 2.0, %v2720_v63  ;;  %v2735_v10 = vmul.f32 %v1955_v62, %v1114_v3  ;;  %v1084_v54 = vmul.f32 1.442695, %v1022_v51 }
 0x1bd   : > { %1968 = vrcp.f32 %v1169_v18  ;;  %v1171_v0 = vadd.f32 2.0, %v2725_v1  ;;  %v2739_v17 = vadd.f32 %v2521_v53, %v1648_v56  ;;  %v1020_v47 = vmin.f32 %v2731_v59, 20.0 }
 0x1be   : > { %v1959_v19 = vpop.eup %1958  ;;  %v1264_v11 = vmul.f32 %v1232_v34, %v2535_v16  ;;  %1970 = vrcp.f32 %v1170_v7  ;;  %v1178_v6 = vadd.f32 2.0, %v2735_v10  ;;  %v2747_v45 = vadd.f32 %v2647_v5, %v2408_v24 }
 0x1bf   : > { %v1961_v43 = vpop.eup %1960  ;;  %1972 = vrcp.f32 %v1171_v0  ;;  %v1112_v31 = vadd.f32 2.0, %v1959_v19  ;;  %v1014_v22 = vmin.f32 %v2739_v17, 20.0  ;;  %v1080_v23 = vmul.f32 1.442695, %v1020_v47 }
 0x1c0   : > { %v1963_v35 = vpop.eup %1962  ;;  %v1303_v53 = vmul.f32 %v2499_v13, %v1264_v11  ;;  %1974 = vrcp.f32 %v1178_v6  ;;  %v1108_v16 = vadd.f32 2.0, %v1961_v43  ;;  %v1023_v24 = vmin.f32 %v2747_v45, 20.0 }
 0x1c1   : > { %v2750_v25 = vmul.f32 %v1959_v19, %v1112_v31  ;;  %v1115_v14 = vadd.f32 2.0, %v1963_v35  ;;  %1976 = vpow2.f32 %v1084_v54  ;;  %v1068_v37 = vmul.f32 1.442695, %v1014_v22 }
 0x1c2   : > { %v1342_v33 = vadd.f32 %v2510_v20, %v1303_v53  ;;  %v2753_v42 = vmul.f32 %v1961_v43, %v1108_v16  ;;  %1978 = vpow2.f32 %v1080_v23  ;;  %v1965_v5 = vpop.eup %1964  ;;  %v1651_v57 = vadd.f32 %v2651_v28, %v2645_v50 }
 0x1c3   : > { %v1176_v21 = vadd.f32 2.0, %v2750_v25  ;;  %v2757_v61 = vmul.f32 %v1963_v35, %v1115_v14  ;;  %1980 = vpow2.f32 %v1068_v37  ;;  %v1109_v29 = vadd.f32 2.0, %v1965_v5 }
 0x1c4   : > { %1374 = vst [vmem:[%s2543_s22 + $0x80] sm:$0xff] %v1342_v33  ;;  %v1172_v8 = vadd.f32 2.0, %v2753_v42  ;;  %v1086_v39 = vmul.f32 1.442695, %v1023_v24  ;;  %v2765_v9 = vadd.f32 %v2404_v12, %v2655_v41  ;;  %v2769_v49 = vadd.f32 %v2539_v36, %v1651_v57 }
 0x1c5   : > { %1982 = vrcp.f32 %v1176_v21  ;;  %v1179_v27 = vadd.f32 2.0, %v2757_v61  ;;  %v1967_v62 = vpop.eup %1966  ;;  %v2771_v58 = vmul.f32 %v1965_v5, %v1109_v29 }
 0x1c6   : > { %1984 = vrcp.f32 %v1172_v8  ;;  %v1021_v50 = vmin.f32 %v2765_v9, 20.0  ;;  %v1113_v38 = vadd.f32 2.0, %v1967_v62  ;;  %v1015_v3 = vmin.f32 %v2769_v49, 20.0 }
 0x1c7   : > { %v1969_v28 = vpop.eup %1968  ;;  %1986 = vrcp.f32 %v1179_v27  ;;  %v1173_v41 = vadd.f32 2.0, %v2771_v58 }
 0x1c8   : > { %v1971_v30 = vpop.eup %1970  ;;  %v1233_v12 = vmul.f32 %v1969_v28, %v2717_v26  ;;  %1988 = vpow2.f32 %v1086_v39  ;;  %v1082_v51 = vmul.f32 1.442695, %v1021_v50  ;;  %v2778_v18 = vmul.f32 %v1967_v62, %v1113_v38 }
 0x1c9   : > { %v1973_v36 = vpop.eup %1972  ;;  %v1234_v4 = vmul.f32 %v1971_v30, %v2720_v63  ;;  %v1070_v56 = vmul.f32 1.442695, %v1015_v3  ;;  %1990 = vrcp.f32 %v1173_v41 }
 0x1ca   : > { %v1975_v34 = vpop.eup %1974  ;;  %v1265_v7 = vmul.f32 %v1233_v12, %v2614_v32  ;;  %v1235_v0 = vmul.f32 %v1973_v36, %v2725_v1  ;;  %v1177_v11 = vadd.f32 2.0, %v2778_v18 }
 0x1cb   : > { %v1977_v54 = vpop.eup %1976  ;;  %v1266_v19 = vmul.f32 %v1234_v4, %v2620_v15  ;;  %v1242_v26 = vmul.f32 %v1975_v34, %v2735_v10  ;;  %1992 = vpow2.f32 %v1070_v56 }
 0x1cc   : > { %v1979_v6 = vpop.eup %1978  ;;  %v1304_v63 = vmul.f32 %v2499_v13, %v1265_v7  ;;  %v1267_v47 = vmul.f32 %v1235_v0, %v2628_v2  ;;  %v1118_v43 = vadd.f32 2.0, %v1977_v54  ;;  %1994 = vpow2.f32 %v1082_v51 }
 0x1cd   : > { %v1981_v32 = vpop.eup %1980  ;;  %v1305_v1 = vmul.f32 %v2499_v13, %v1266_v19  ;;  %v1274_v31 = vmul.f32 %v1242_v26, %v2623_v60  ;;  %1996 = vrcp.f32 %v1177_v11  ;;  %v1116_v15 = vadd.f32 2.0, %v1979_v6 }
 0x1ce   : > { %v1343_v10 = vadd.f32 %v2510_v20, %v1304_v63  ;;  %v1306_v22 = vmul.f32 %v2499_v13, %v1267_v47  ;;  %v1150_v35 = vmul.f32 %v1977_v54, %v1118_v43  ;;  %v1110_v53 = vadd.f32 2.0, %v1981_v32 }
 0x1cf   : > { %v1983_v16 = vpop.eup %1982  ;;  %v1344_v2 = vadd.f32 %v2510_v20, %v1305_v1  ;;  %v1313_v23 = vmul.f32 %v2499_v13, %v1274_v31  ;;  %v1148_v14 = vmul.f32 %v1979_v6, %v1116_v15 }
 0x1d0   : > { %v1985_v37 = vpop.eup %1984  ;;  %1375 = vst [vmem:[%s2543_s22 + $0x88] sm:$0xff] %v1343_v10  ;;  %v1345_v60 = vadd.f32 %v2510_v20, %v1306_v22  ;;  %v1240_v33 = vmul.f32 %v1983_v16, %v2750_v25  ;;  %v1182_v24 = vadd.f32 2.0, %v1150_v35  ;;  %v1142_v5 = vmul.f32 %v1981_v32, %v1110_v53 }
 0x1d1   : > { %v1987_v21 = vpop.eup %1986  ;;  %1376 = vst [vmem:[%s2543_s22 + $0x90] sm:$0xff] %v1344_v2  ;;  %v1352_v57 = vadd.f32 %v2510_v20, %v1313_v23  ;;  %v1236_v8 = vmul.f32 %v1985_v37, %v2753_v42  ;;  %v1180_v29 = vadd.f32 2.0, %v1148_v14 }
 0x1d2   : > { %v1989_v39 = vpop.eup %1988  ;;  %1377 = vst [vmem:[%s2543_s22 + $0x98] sm:$0xff] %v1345_v60  ;;  %v1272_v27 = vmul.f32 %v1240_v33, %v2666_v48  ;;  %v1243_v62 = vmul.f32 %v1987_v21, %v2757_v61  ;;  %1998 = vrcp.f32 %v1182_v24  ;;  %v1174_v50 = vadd.f32 2.0, %v1142_v5 }
 0x1d3   : > { %1384 = vst [vmem:[%s2543_s22 + $0xd0] sm:$0xff] %v1352_v57  ;;  %v1268_v25 = vmul.f32 %v1236_v8, %v2671_v55  ;;  %2000 = vrcp.f32 %v1180_v29  ;;  %v1119_v28 = vadd.f32 2.0, %v1989_v39  ;;  %v1991_v38 = vpop.eup %1990 }
 0x1d4   : > { %v1311_v3 = vmul.f32 %v2499_v13, %v1272_v27  ;;  %v1275_v42 = vmul.f32 %v1243_v62, %v2679_v46  ;;  %2002 = vrcp.f32 %v1174_v50  ;;  %v1237_v48 = vmul.f32 %v1991_v38, %v2771_v58 }
 0x1d5   : > { %v1993_v30 = vpop.eup %1992  ;;  %v1307_v12 = vmul.f32 %v2499_v13, %v1268_v25  ;;  %v1151_v61 = vmul.f32 %v1989_v39, %v1119_v28 }
 0x1d6   : > { %v1995_v41 = vpop.eup %1994  ;;  %v1350_v51 = vadd.f32 %v2510_v20, %v1311_v3  ;;  %v1314_v55 = vmul.f32 %v2499_v13, %v1275_v42  ;;  %v1111_v36 = vadd.f32 2.0, %v1993_v30  ;;  %v1269_v46 = vmul.f32 %v1237_v48, %v2693_v40 }
 0x1d7   : > { %v1997_v4 = vpop.eup %1996  ;;  %v1346_v56 = vadd.f32 %v2510_v20, %v1307_v12  ;;  %v1183_v34 = vadd.f32 2.0, %v1151_v61  ;;  %v1117_v7 = vadd.f32 2.0, %v1995_v41 }
 0x1d8   : > { %1382 = vst [vmem:[%s2543_s22 + $0xc0] sm:$0xff] %v1350_v51  ;;  %v1353_v0 = vadd.f32 %v2510_v20, %v1314_v55  ;;  %v1241_v58 = vmul.f32 %v1997_v4, %v2778_v18  ;;  %v1143_v54 = vmul.f32 %v1993_v30, %v1111_v36  ;;  %v1308_v19 = vmul.f32 %v2499_v13, %v1269_v46 }
 0x1d9   : > { %1378 = vst [vmem:[%s2543_s22 + $0xa0] sm:$0xff] %v1346_v56  ;;  %2004 = vrcp.f32 %v1183_v34  ;;  %v1149_v26 = vmul.f32 %v1995_v41, %v1117_v7 }
 0x1da   : > { %1385 = vst [vmem:[%s2543_s22 + $0xd8] sm:$0xff] %v1353_v0  ;;  %v1273_v11 = vmul.f32 %v1241_v58, %v2704_v44  ;;  %v1175_v6 = vadd.f32 2.0, %v1143_v54  ;;  %v1347_v40 = vadd.f32 %v2510_v20, %v1308_v19 }
 0x1db   : > { %v1181_v63 = vadd.f32 2.0, %v1149_v26 }
 0x1dc   : > { %v1999_v47 = vpop.eup %1998  ;;  %v1312_v43 = vmul.f32 %v2499_v13, %v1273_v11  ;;  %2006 = vrcp.f32 %v1175_v6  ;;  %1379 = vst [vmem:[%s2543_s22 + $0xa8] sm:$0xff] %v1347_v40 }
 0x1dd   : > { %v2001_v32 = vpop.eup %2000  ;;  %v1246_v18 = vmul.f32 %v1999_v47, %v1150_v35  ;;  %2008 = vrcp.f32 %v1181_v63 }
 0x1de   : > { %v2003_v1 = vpop.eup %2002  ;;  %v1351_v31 = vadd.f32 %v2510_v20, %v1312_v43  ;;  %v1244_v15 = vmul.f32 %v2001_v32, %v1148_v14 }
 0x1df   : > { %v1278_v44 = vmul.f32 %v1246_v18, %v2713_v52  ;;  %v1238_v10 = vmul.f32 %v2003_v1, %v1142_v5 }
 0x1e0   : > { %1383 = vst [vmem:[%s2543_s22 + $0xc8] sm:$0xff] %v1351_v31  ;;  %v1276_v22 = vmul.f32 %v1244_v15, %v2731_v59 }
 0x1e1   : > { %v1317_v53 = vmul.f32 %v2499_v13, %v1278_v44  ;;  %v1270_v16 = vmul.f32 %v1238_v10, %v2739_v17 }
 0x1e2   : > { %v1315_v35 = vmul.f32 %v2499_v13, %v1276_v22 }
 0x1e3   : > { %v2005_v2 = vpop.eup %2004  ;;  %v1356_v23 = vadd.f32 %v2510_v20, %v1317_v53  ;;  %v1309_v37 = vmul.f32 %v2499_v13, %v1270_v16 }
 0x1e4   : > { %v1354_v14 = vadd.f32 %v2510_v20, %v1315_v35  ;;  %v1247_v52 = vmul.f32 %v2005_v2, %v1151_v61 }
 0x1e5   : > { %1388 = vst [vmem:[%s2543_s22 + $0xf0] sm:$0xff] %v1356_v23  ;;  %v1348_v59 = vadd.f32 %v2510_v20, %v1309_v37 }
 0x1e6   : > { %v2007_v60 = vpop.eup %2006  ;;  %1386 = vst [vmem:[%s2543_s22 + $0xe0] sm:$0xff] %v1354_v14  ;;  %v1279_v17 = vmul.f32 %v1247_v52, %v2747_v45 }
 0x1e7   : > { %v2009_v33 = vpop.eup %2008  ;;  %1380 = vst [vmem:[%s2543_s22 + $0xb0] sm:$0xff] %v1348_v59  ;;  %v1239_v24 = vmul.f32 %v2007_v60, %v1143_v54 }
 0x1e8   : > { %v1318_v5 = vmul.f32 %v2499_v13, %v1279_v17  ;;  %v1245_v21 = vmul.f32 %v2009_v33, %v1149_v26 }
 0x1e9   : > { %v1271_v57 = vmul.f32 %v1239_v24, %v2769_v49 }
 0x1ea   : > { %v1357_v8 = vadd.f32 %v2510_v20, %v1318_v5  ;;  %v1277_v29 = vmul.f32 %v1245_v21, %v2765_v9 }
 0x1eb   : > { %v1310_v45 = vmul.f32 %v2499_v13, %v1271_v57 }
 0x1ec   : > { %1389 = vst [vmem:[%s2543_s22 + $0xf8] sm:$0xff] %v1357_v8  ;;  %v1316_v39 = vmul.f32 %v2499_v13, %v1277_v29 }
 0x1ed   : > { %v1349_v27 = vadd.f32 %v2510_v20, %v1310_v45 }
 0x1ee   : > { %v1355_v9 = vadd.f32 %v2510_v20, %v1316_v39 }
 0x1ef   : > { %1381 = vst [vmem:[%s2543_s22 + $0xb8] sm:$0xff] %v1349_v27 }
 0x1f0   : > { %1387 = vst [vmem:[%s2543_s22 + $0xe8] sm:$0xff] %v1355_v9 }
 0x1f1   : > { %2081 = shalt.err (!%p2078_p5)
}
 0x1f2   : > { %s2082_s23 = scalar_lea.hbm %s2850_s11, 4096  ;;  %s2086_s14 = scalar_lea.hbm %s2908_s4, 8192 }
 0x1f3   : > { %p2083_p9 = scmp.ne.s32.totalorder %s2850_s11, %s2082_s23  ;;  %p2087_p3 = scmp.lt.u32.totalorder %s2850_s11, %s2908_s4 }
 0x1f4   : > { %p2088_p7 = scmp.lt.u32.totalorder %s2086_s14, %s2082_s23  ;;  %p2090_p4 = scmp.lt.u32.totalorder %s2082_s23, %s2850_s11 }
 0x1f5   : > { %p2084_p1 = pnand %p2083_p9, %p2288_p10 }
 0x1f6   : > { %p2089_p13 = por %p2088_p7, %p2087_p3 }
 0x1f7   : > { %p2085_p2 = pneg %p2084_p1 }
 0x1f8   : > { %p2091_p6 = por %p2090_p4, %p2089_p13 }
 0x1fa   : > { %p2092_p8 = pnand %p2091_p6, %p2085_p2 }
 0x1fc   : > { %2095 = shalt.err (!%p2092_p8)
}
 0x1fd   : > { %s2162_s28 = smov 128   ;;  %s2163_s6 = smov 8  }
 0x1fe   : > { %1770 = dma.vmem_to_hbm [thread:$0]  (%p2288_p10), %s2852_s8, 4096, %s2850_s11, %s1391_s18, %s2162_s28, %s2162_s28, %s2163_s6  }
 0x1ff PF: > { %s1421_s9 = sand.u32 1, %s2134_s15   ;;  %p2926_p12 = scmp.ne.s32.totalorder %s2916_s26, 0 }
 0x200   : > { %p2927_p11 = scmp.ge.s32.totalorder %s2154_s20, 2  ;;  %s1422_s13 = scalar_lea.sflag [#allocation5], %s1421_s9 }
 0x202   : > { %p1781_p0 = pnand %p2927_p11, %p2926_p12 }
 0x204   : > { %2129 = dma.done.wait (!%p1781_p0), %s1422_s13, 4096  }
 0x205   : > { %2131 = vsyncadd (!%p1781_p0), %s1422_s13, 4294963200  ;;  %s21_s20 = sadd.s32 1, %s2154_s20   ;;  %s2928_s15 = smov %s2138_s16 }
 0x206   : > { %p18_p5 = scmp.ge.s32.totalorder %s21_s20, 4   ;;  %s2929_s16 = smov %s2142_s17 }
 0x207   : > { %s2930_s17 = smov %s2297_s10  ;;  %s2931_s18 = smov %s2150_s19 }
 0x208   : > { %s2932_s19 = smov %s2934_s5  ;;  %20 = sbr.rel (!%p18_p5) target bundleno = 7 (0x7), region = 87 }
 0x20f   :  { %1427 = vsyncpa [#allocation4], 1 }
 0x210   :  { %1429 = vsyncpa [#allocation4 + $0x1], 1 }
 0x211   :  { %1430 = vsyncpa [#allocation7], 1 }
 0x212   :  { %1431 = vsyncpa [#allocation5], 1 }
 0x213   :  { %1433 = vsyncpa [#allocation5 + $0x1], 1 }

</bundles_post_ra>
